<compile_context>
chip_gen: v7x
topology: tpu7x:2x2x1
jax: 0.10.0
libtpu: 0.0.40
codegen_flags: <defaults>
</compile_context>

<pallas_src>
import functools

import jax
import jax.numpy as jnp
from jax.experimental import pallas as pl
from jax.experimental.pallas import tpu as pltpu


LANE = 128  # feature channels / d_model kept at the TPU lane width (lane-dense I/O)


# ----------------------------------------------------------------------------
# Kernel 1: backbone stage — 3x3 conv (stride 1, pad 1) + bias + ReLU.
#
# The wrapper zero-pads the image and row-flattens it to (B, (H+3)*(W+2), Cin).
# Inside the kernel each of the 9 taps is a contiguous (M, Cin) slice of that
# flattened block (M = H*(W+2), includes 2 junk columns per row that the wrapper
# slices off), so the conv becomes 9 accumulated MXU matmuls entirely in VMEM —
# no im2col round trip through HBM.  grid=(B,) gives >=2 parallel steps (megacore).
# TODO(synk): at real HRNet resolutions tile M over rows and cast to bf16 on v6e/v7x.
# ----------------------------------------------------------------------------
def _conv3x3_relu_kernel(xflat_ref, w_ref, b_ref, o_ref, *, wp):
    # xflat_ref: (1, Lpad, Cin)   w_ref: (9, Cin, 128)   b_ref: (1, 128)
    # o_ref:     (1, M, 128)      with M = H * wp, wp = W + 2
    M = o_ref.shape[1]
    Cout = o_ref.shape[2]
    acc = jnp.zeros((M, Cout), jnp.float32)
    tap = 0
    for dy in range(3):
        for dx in range(3):
            off = dy * wp + dx                       # static row offset of this tap
            lhs = xflat_ref[0, off:off + M, :]       # (M, Cin) VMEM load
            acc = acc + jnp.dot(lhs, w_ref[tap], preferred_element_type=jnp.float32)
            tap += 1
    acc = jnp.maximum(acc + b_ref[...], 0.0)
    o_ref[0] = acc.astype(o_ref.dtype)


def backbone_conv3x3_relu(images_nhwc, w, b):
    B, H, W, Cin = images_nhwc.shape
    Cout = w.shape[-1]
    Wp = W + 2
    # pad: 1 top, 2 bottom (extra bottom row keeps every shifted slice of the
    # row-flattened image in bounds), 1 left / right.
    xp = jnp.pad(images_nhwc, ((0, 0), (1, 2), (1, 1), (0, 0)))
    Lpad = (H + 3) * Wp
    xflat = xp.reshape(B, Lpad, Cin)
    M = H * Wp                                       # 2 junk cols per row, sliced below
    wtaps = w.reshape(9, Cin, Cout)
    bias = b.reshape(1, Cout)

    out = pl.pallas_call(
        functools.partial(_conv3x3_relu_kernel, wp=Wp),
        out_shape=jax.ShapeDtypeStruct((B, M, Cout), jnp.float32),
        grid=(B,),
        in_specs=[
            pl.BlockSpec((1, Lpad, Cin), lambda bi: (bi, 0, 0)),
            pl.BlockSpec((9, Cin, Cout), lambda bi: (0, 0, 0)),   # weights stay resident
            pl.BlockSpec((1, Cout), lambda bi: (0, 0)),
        ],
        out_specs=pl.BlockSpec((1, M, Cout), lambda bi: (bi, 0, 0)),
        compiler_params=pltpu.CompilerParams(
            dimension_semantics=("parallel",),
            vmem_limit_bytes=32 * 1024 * 1024,
        ),
    )(xflat, wtaps, bias)
    return out.reshape(B, H, Wp, Cout)[:, :, :W, :]


# ----------------------------------------------------------------------------
# JAX glue: bilinear sampling of backbone features at normalized ([-1,1]) coords.
# align_corners=False convention (PyTorch F.grid_sample default).
# TODO(synk): data-dependent gather kept in XLA; fusing it into the transformer
#             kernel would need an in-kernel dynamic gather (no clean BlockSpec).
# TODO(synk): out-of-range coords are clamped (border) rather than zero-padded.
# ----------------------------------------------------------------------------
def bilinear_sample(features, coords):
    B, H, W, C = features.shape
    x = ((coords[..., 0] + 1.0) * W - 1.0) * 0.5
    y = ((coords[..., 1] + 1.0) * H - 1.0) * 0.5
    x = jnp.clip(x, 0.0, W - 1)
    y = jnp.clip(y, 0.0, H - 1)
    x0 = jnp.floor(x)
    y0 = jnp.floor(y)
    x1 = jnp.clip(x0 + 1, 0, W - 1)
    y1 = jnp.clip(y0 + 1, 0, H - 1)
    wx = (x - x0)[..., None]
    wy = (y - y0)[..., None]
    x0i, x1i = x0.astype(jnp.int32), x1.astype(jnp.int32)
    y0i, y1i = y0.astype(jnp.int32), y1.astype(jnp.int32)
    bidx = jnp.arange(B)[:, None]
    f00 = features[bidx, y0i, x0i]
    f01 = features[bidx, y0i, x1i]
    f10 = features[bidx, y1i, x0i]
    f11 = features[bidx, y1i, x1i]
    top = f00 * (1.0 - wx) + f01 * wx
    bot = f10 * (1.0 - wx) + f11 * wx
    return top * (1.0 - wy) + bot * wy


# ----------------------------------------------------------------------------
# Kernel 2: fused "PoseTransformer" block — whole batch in one grid step.
# Linear layers run on (B*J, D) (batch folded into M); attention uses a
# block-diagonal additive mask so tokens only attend within their own batch
# element (mathematically identical to per-batch softmax).  Output is the
# lane-dense (B*J, 128) residual; the (128, 3) regression head runs in XLA.
# TODO(synk): full PoseTransformer stack (config not given) reduced to one block.
# ----------------------------------------------------------------------------
def _pose_transformer_kernel(x_ref, mask_ref, we_ref, wq_ref, wk_ref, wv_ref,
                             wo_ref, w1_ref, w2_ref, o_ref):
    x = x_ref[...]                                                    # (BJ, Fin)
    h = jnp.dot(x, we_ref[...], preferred_element_type=jnp.float32)  # (BJ, D)
    q = jnp.dot(h, wq_ref[...], preferred_element_type=jnp.float32)
    k = jnp.dot(h, wk_ref[...], preferred_element_type=jnp.float32)
    v = jnp.dot(h, wv_ref[...], preferred_element_type=jnp.float32)
    scale = 1.0 / float(q.shape[-1]) ** 0.5
    s = jnp.dot(q, k.T, preferred_element_type=jnp.float32) * scale  # (BJ, BJ)
    s = s + mask_ref[...]                       # block-diagonal mask (0 / -1e30)
    s = s - jnp.max(s, axis=-1, keepdims=True)
    p = jnp.exp(s)
    inv_l = pl.reciprocal(jnp.sum(p, axis=-1, keepdims=True), approx=True)
    attn = p * inv_l
    ctx = jnp.dot(attn, v, preferred_element_type=jnp.float32)
    y = jnp.dot(ctx, wo_ref[...], preferred_element_type=jnp.float32) + h
    m = jnp.maximum(jnp.dot(y, w1_ref[...], preferred_element_type=jnp.float32), 0.0)
    y2 = jnp.dot(m, w2_ref[...], preferred_element_type=jnp.float32) + y
    o_ref[...] = y2.astype(o_ref.dtype)


def pose_transformer_residual(tokens2d, attn_bias, params):
    BJ, Fin = tokens2d.shape
    D = params["wq"].shape[0]
    Dff = params["w1"].shape[1]
    return pl.pallas_call(
        _pose_transformer_kernel,
        out_shape=jax.ShapeDtypeStruct((BJ, D), jnp.float32),
        grid=(1,),
        in_specs=[
            pl.BlockSpec((BJ, Fin), lambda i: (0, 0)),
            pl.BlockSpec((BJ, BJ), lambda i: (0, 0)),
            pl.BlockSpec((Fin, D), lambda i: (0, 0)),
            pl.BlockSpec((D, D), lambda i: (0, 0)),
            pl.BlockSpec((D, D), lambda i: (0, 0)),
            pl.BlockSpec((D, D), lambda i: (0, 0)),
            pl.BlockSpec((D, D), lambda i: (0, 0)),
            pl.BlockSpec((D, Dff), lambda i: (0, 0)),
            pl.BlockSpec((Dff, D), lambda i: (0, 0)),
        ],
        out_specs=pl.BlockSpec((BJ, D), lambda i: (0, 0)),
        compiler_params=pltpu.CompilerParams(
            dimension_semantics=("arbitrary",),
            vmem_limit_bytes=32 * 1024 * 1024,
        ),
    )(tokens2d, attn_bias, params["w_embed"], params["wq"], params["wk"],
      params["wv"], params["wo"], params["w1"], params["w2"])


# ----------------------------------------------------------------------------
# Parameter init (deterministic, synthetic — no checkpoint loading).
# ----------------------------------------------------------------------------
def init_params(key, cin=3, cfeat=LANE, d_model=LANE, d_ff=2 * LANE):
    ks = jax.random.split(key, 10)
    fin = 2 + 2 + cfeat  # kp_cpn(2) + kp_crop_norm(2) + sampled feature(cfeat)

    def lin(k, shape):
        return jax.random.normal(k, shape, jnp.float32) / (shape[0] ** 0.5)

    return {
        # TODO(synk): single 3x3 conv stage stands in for the full pose_hrnet backbone.
        "conv_w": jax.random.normal(ks[0], (3, 3, cin, cfeat), jnp.float32)
        / ((9 * cin) ** 0.5),
        "conv_b": jnp.zeros((cfeat,), jnp.float32),
        "w_embed": lin(ks[1], (fin, d_model)),
        "wq": lin(ks[2], (d_model, d_model)),
        "wk": lin(ks[3], (d_model, d_model)),
        "wv": lin(ks[4], (d_model, d_model)),
        "wo": lin(ks[5], (d_model, d_model)),
        "w1": lin(ks[6], (d_model, d_ff)),
        "w2": lin(ks[7], (d_ff, d_model)),
        "w_head": lin(ks[8], (d_model, 3)),
    }


# ----------------------------------------------------------------------------
# Full forward, mirroring VolumetricTriangulationNet.forward
# ----------------------------------------------------------------------------
@jax.jit
def volumetric_triangulation_forward(params, images, keypoints_2d_cpn,
                                     keypoints_2d_cpn_crop):
    # torch: kp_crop[..., :2] /= [192//2, 256//2]; -= 1   (plain JAX — 68 floats,
    # not worth a pallas_call; constants folded at compile time)
    crop_norm = (keypoints_2d_cpn_crop.astype(jnp.float32)
                 * jnp.array([2.0 / 192.0, 2.0 / 256.0], jnp.float32) - 1.0)

    feats = backbone_conv3x3_relu(images, params["conv_w"], params["conv_b"])  # Pallas
    sampled = bilinear_sample(feats, crop_norm)                                # XLA glue

    B, J, _ = crop_norm.shape
    tokens = jnp.concatenate(
        [keypoints_2d_cpn.astype(jnp.float32), crop_norm, sampled], axis=-1)
    tokens2d = tokens.reshape(B * J, -1)

    # block-diagonal additive attention bias: 0 within a batch element, -1e30 across.
    bid = jnp.repeat(jnp.arange(B), J)
    attn_bias = jnp.where(bid[:, None] == bid[None, :], 0.0, -1e30).astype(jnp.float32)

    resid = pose_transformer_residual(tokens2d, attn_bias, params)            # Pallas
    keypoints_3d = (resid @ params["w_head"]).reshape(B, J, 3)                # XLA head
    return keypoints_3d


if __name__ == "__main__":
    key = jax.random.PRNGKey(0)
    k_img, k_cpn, k_crop, k_par = jax.random.split(key, 4)

    B, H, W, Cin = 2, 16, 16, 3
    J = 17  # num_joints

    images = jax.random.normal(k_img, (B, H, W, Cin), jnp.float32)
    # keypoints_2d_cpn: already-normalized 2D keypoints (as produced by the dataset)
    keypoints_2d_cpn = jax.random.uniform(k_cpn, (B, J, 2), jnp.float32, -1.0, 1.0)
    # keypoints_2d_cpn_crop: pixel coords in the 192x256 crop (normalized inside forward)
    keypoints_2d_cpn_crop = jax.random.uniform(
        k_crop, (B, J, 2), jnp.float32) * jnp.array([192.0, 256.0], jnp.float32)

    params = init_params(k_par, cin=Cin)

    out = volumetric_triangulation_forward(
        params, images, keypoints_2d_cpn, keypoints_2d_cpn_crop)
    out = jax.block_until_ready(out)

    assert out.shape == (B, J, 3), out.shape
    assert bool(jnp.all(jnp.isfinite(out)))
    print("KERNEL_OK")
</pallas_src>

<mosaic_0001>
module attributes {stable_mosaic.version = 11 : i64} {
  func.func @_conv3x3_relu_kernel(%arg0: i32, %arg1: memref<1x342x3xf32, #tpu.memory_space<vmem>>, %arg2: memref<9x3x128xf32, #tpu.memory_space<vmem>>, %arg3: memref<1x128xf32, #tpu.memory_space<vmem>>, %arg4: memref<1x288x128xf32, #tpu.memory_space<vmem>>) attributes {dimension_semantics = [#tpu.dimension_semantics<parallel>], iteration_bounds = array<i64: 2>, scalar_prefetch = 0 : i64, scratch_operands = 0 : i64, tpu.core_type = #tpu.core_type<tc>, window_params = [{transform_indices = @transform_0, window_bounds = array<i64: 1, 342, 3>}, {pipeline_mode = #tpu.pipeline_mode<synchronous>, transform_indices = @transform_1, window_bounds = array<i64: 9, 3, 128>}, {pipeline_mode = #tpu.pipeline_mode<synchronous>, transform_indices = @transform_2, window_bounds = array<i64: 1, 128>}, {transform_indices = @transform_3, window_bounds = array<i64: 1, 288, 128>}]} {
    %cst = arith.constant 0.000000e+00 : f32
    %0 = vector.broadcast %cst : f32 to vector<288x128xf32>
    %c0 = arith.constant 0 : index
    %c0_0 = arith.constant 0 : index
    %c0_1 = arith.constant 0 : index
    %1 = vector.load %arg1[%c0, %c0_0, %c0_1] : memref<1x342x3xf32, #tpu.memory_space<vmem>>, vector<1x288x3xf32>
    %2 = vector.shape_cast %1 : vector<1x288x3xf32> to vector<288x3xf32>
    %c0_2 = arith.constant 0 : index
    %c0_3 = arith.constant 0 : index
    %c0_4 = arith.constant 0 : index
    %3 = vector.load %arg2[%c0_2, %c0_3, %c0_4] : memref<9x3x128xf32, #tpu.memory_space<vmem>>, vector<1x3x128xf32>
    %4 = vector.shape_cast %3 : vector<1x3x128xf32> to vector<3x128xf32>
    %cst_5 = arith.constant dense<0.000000e+00> : vector<288x128xf32>
    %5 = tpu.matmul %2, %4, %cst_5 {dimension_numbers = #tpu.dot_dimension_numbers<[1], [0], [0], [1], [0, 0, 1, 1], [], []>} : vector<288x3xf32>, vector<3x128xf32>, vector<288x128xf32> -> vector<288x128xf32>
    %6 = arith.addf %0, %5 : vector<288x128xf32>
    %c0_6 = arith.constant 0 : index
    %c1 = arith.constant 1 : index
    %c0_7 = arith.constant 0 : index
    %7 = vector.load %arg1[%c0_6, %c1, %c0_7] : memref<1x342x3xf32, #tpu.memory_space<vmem>>, vector<1x288x3xf32>
    %8 = vector.shape_cast %7 : vector<1x288x3xf32> to vector<288x3xf32>
    %c1_8 = arith.constant 1 : index
    %c0_9 = arith.constant 0 : index
    %c0_10 = arith.constant 0 : index
    %9 = vector.load %arg2[%c1_8, %c0_9, %c0_10] : memref<9x3x128xf32, #tpu.memory_space<vmem>>, vector<1x3x128xf32>
    %10 = vector.shape_cast %9 : vector<1x3x128xf32> to vector<3x128xf32>
    %cst_11 = arith.constant dense<0.000000e+00> : vector<288x128xf32>
    %11 = tpu.matmul %8, %10, %cst_11 {dimension_numbers = #tpu.dot_dimension_numbers<[1], [0], [0], [1], [0, 0, 1, 1], [], []>} : vector<288x3xf32>, vector<3x128xf32>, vector<288x128xf32> -> vector<288x128xf32>
    %12 = arith.addf %6, %11 : vector<288x128xf32>
    %c0_12 = arith.constant 0 : index
    %c2 = arith.constant 2 : index
    %c0_13 = arith.constant 0 : index
    %13 = vector.load %arg1[%c0_12, %c2, %c0_13] : memref<1x342x3xf32, #tpu.memory_space<vmem>>, vector<1x288x3xf32>
    %14 = vector.shape_cast %13 : vector<1x288x3xf32> to vector<288x3xf32>
    %c2_14 = arith.constant 2 : index
    %c0_15 = arith.constant 0 : index
    %c0_16 = arith.constant 0 : index
    %15 = vector.load %arg2[%c2_14, %c0_15, %c0_16] : memref<9x3x128xf32, #tpu.memory_space<vmem>>, vector<1x3x128xf32>
    %16 = vector.shape_cast %15 : vector<1x3x128xf32> to vector<3x128xf32>
    %cst_17 = arith.constant dense<0.000000e+00> : vector<288x128xf32>
    %17 = tpu.matmul %14, %16, %cst_17 {dimension_numbers = #tpu.dot_dimension_numbers<[1], [0], [0], [1], [0, 0, 1, 1], [], []>} : vector<288x3xf32>, vector<3x128xf32>, vector<288x128xf32> -> vector<288x128xf32>
    %18 = arith.addf %12, %17 : vector<288x128xf32>
    %c0_18 = arith.constant 0 : index
    %c18 = arith.constant 18 : index
    %c0_19 = arith.constant 0 : index
    %19 = vector.load %arg1[%c0_18, %c18, %c0_19] : memref<1x342x3xf32, #tpu.memory_space<vmem>>, vector<1x288x3xf32>
    %20 = vector.shape_cast %19 : vector<1x288x3xf32> to vector<288x3xf32>
    %c3 = arith.constant 3 : index
    %c0_20 = arith.constant 0 : index
    %c0_21 = arith.constant 0 : index
    %21 = vector.load %arg2[%c3, %c0_20, %c0_21] : memref<9x3x128xf32, #tpu.memory_space<vmem>>, vector<1x3x128xf32>
    %22 = vector.shape_cast %21 : vector<1x3x128xf32> to vector<3x128xf32>
    %cst_22 = arith.constant dense<0.000000e+00> : vector<288x128xf32>
    %23 = tpu.matmul %20, %22, %cst_22 {dimension_numbers = #tpu.dot_dimension_numbers<[1], [0], [0], [1], [0, 0, 1, 1], [], []>} : vector<288x3xf32>, vector<3x128xf32>, vector<288x128xf32> -> vector<288x128xf32>
    %24 = arith.addf %18, %23 : vector<288x128xf32>
    %c0_23 = arith.constant 0 : index
    %c19 = arith.constant 19 : index
    %c0_24 = arith.constant 0 : index
    %25 = vector.load %arg1[%c0_23, %c19, %c0_24] : memref<1x342x3xf32, #tpu.memory_space<vmem>>, vector<1x288x3xf32>
    %26 = vector.shape_cast %25 : vector<1x288x3xf32> to vector<288x3xf32>
    %c4 = arith.constant 4 : index
    %c0_25 = arith.constant 0 : index
    %c0_26 = arith.constant 0 : index
    %27 = vector.load %arg2[%c4, %c0_25, %c0_26] : memref<9x3x128xf32, #tpu.memory_space<vmem>>, vector<1x3x128xf32>
    %28 = vector.shape_cast %27 : vector<1x3x128xf32> to vector<3x128xf32>
    %cst_27 = arith.constant dense<0.000000e+00> : vector<288x128xf32>
    %29 = tpu.matmul %26, %28, %cst_27 {dimension_numbers = #tpu.dot_dimension_numbers<[1], [0], [0], [1], [0, 0, 1, 1], [], []>} : vector<288x3xf32>, vector<3x128xf32>, vector<288x128xf32> -> vector<288x128xf32>
    %30 = arith.addf %24, %29 : vector<288x128xf32>
    %c0_28 = arith.constant 0 : index
    %c20 = arith.constant 20 : index
    %c0_29 = arith.constant 0 : index
    %31 = vector.load %arg1[%c0_28, %c20, %c0_29] : memref<1x342x3xf32, #tpu.memory_space<vmem>>, vector<1x288x3xf32>
    %32 = vector.shape_cast %31 : vector<1x288x3xf32> to vector<288x3xf32>
    %c5 = arith.constant 5 : index
    %c0_30 = arith.constant 0 : index
    %c0_31 = arith.constant 0 : index
    %33 = vector.load %arg2[%c5, %c0_30, %c0_31] : memref<9x3x128xf32, #tpu.memory_space<vmem>>, vector<1x3x128xf32>
    %34 = vector.shape_cast %33 : vector<1x3x128xf32> to vector<3x128xf32>
    %cst_32 = arith.constant dense<0.000000e+00> : vector<288x128xf32>
    %35 = tpu.matmul %32, %34, %cst_32 {dimension_numbers = #tpu.dot_dimension_numbers<[1], [0], [0], [1], [0, 0, 1, 1], [], []>} : vector<288x3xf32>, vector<3x128xf32>, vector<288x128xf32> -> vector<288x128xf32>
    %36 = arith.addf %30, %35 : vector<288x128xf32>
    %c0_33 = arith.constant 0 : index
    %c36 = arith.constant 36 : index
    %c0_34 = arith.constant 0 : index
    %37 = vector.load %arg1[%c0_33, %c36, %c0_34] : memref<1x342x3xf32, #tpu.memory_space<vmem>>, vector<1x288x3xf32>
    %38 = vector.shape_cast %37 : vector<1x288x3xf32> to vector<288x3xf32>
    %c6 = arith.constant 6 : index
    %c0_35 = arith.constant 0 : index
    %c0_36 = arith.constant 0 : index
    %39 = vector.load %arg2[%c6, %c0_35, %c0_36] : memref<9x3x128xf32, #tpu.memory_space<vmem>>, vector<1x3x128xf32>
    %40 = vector.shape_cast %39 : vector<1x3x128xf32> to vector<3x128xf32>
    %cst_37 = arith.constant dense<0.000000e+00> : vector<288x128xf32>
    %41 = tpu.matmul %38, %40, %cst_37 {dimension_numbers = #tpu.dot_dimension_numbers<[1], [0], [0], [1], [0, 0, 1, 1], [], []>} : vector<288x3xf32>, vector<3x128xf32>, vector<288x128xf32> -> vector<288x128xf32>
    %42 = arith.addf %36, %41 : vector<288x128xf32>
    %c0_38 = arith.constant 0 : index
    %c37 = arith.constant 37 : index
    %c0_39 = arith.constant 0 : index
    %43 = vector.load %arg1[%c0_38, %c37, %c0_39] : memref<1x342x3xf32, #tpu.memory_space<vmem>>, vector<1x288x3xf32>
    %44 = vector.shape_cast %43 : vector<1x288x3xf32> to vector<288x3xf32>
    %c7 = arith.constant 7 : index
    %c0_40 = arith.constant 0 : index
    %c0_41 = arith.constant 0 : index
    %45 = vector.load %arg2[%c7, %c0_40, %c0_41] : memref<9x3x128xf32, #tpu.memory_space<vmem>>, vector<1x3x128xf32>
    %46 = vector.shape_cast %45 : vector<1x3x128xf32> to vector<3x128xf32>
    %cst_42 = arith.constant dense<0.000000e+00> : vector<288x128xf32>
    %47 = tpu.matmul %44, %46, %cst_42 {dimension_numbers = #tpu.dot_dimension_numbers<[1], [0], [0], [1], [0, 0, 1, 1], [], []>} : vector<288x3xf32>, vector<3x128xf32>, vector<288x128xf32> -> vector<288x128xf32>
    %48 = arith.addf %42, %47 : vector<288x128xf32>
    %c0_43 = arith.constant 0 : index
    %c38 = arith.constant 38 : index
    %c0_44 = arith.constant 0 : index
    %49 = vector.load %arg1[%c0_43, %c38, %c0_44] : memref<1x342x3xf32, #tpu.memory_space<vmem>>, vector<1x288x3xf32>
    %50 = vector.shape_cast %49 : vector<1x288x3xf32> to vector<288x3xf32>
    %c8 = arith.constant 8 : index
    %c0_45 = arith.constant 0 : index
    %c0_46 = arith.constant 0 : index
    %51 = vector.load %arg2[%c8, %c0_45, %c0_46] : memref<9x3x128xf32, #tpu.memory_space<vmem>>, vector<1x3x128xf32>
    %52 = vector.shape_cast %51 : vector<1x3x128xf32> to vector<3x128xf32>
    %cst_47 = arith.constant dense<0.000000e+00> : vector<288x128xf32>
    %53 = tpu.matmul %50, %52, %cst_47 {dimension_numbers = #tpu.dot_dimension_numbers<[1], [0], [0], [1], [0, 0, 1, 1], [], []>} : vector<288x3xf32>, vector<3x128xf32>, vector<288x128xf32> -> vector<288x128xf32>
    %54 = arith.addf %48, %53 : vector<288x128xf32>
    %c0_48 = arith.constant 0 : index
    %c0_49 = arith.constant 0 : index
    %55 = vector.load %arg3[%c0_48, %c0_49] : memref<1x128xf32, #tpu.memory_space<vmem>>, vector<1x128xf32>
    %56 = vector.broadcast %55 : vector<1x128xf32> to vector<288x128xf32>
    %57 = arith.addf %54, %56 : vector<288x128xf32>
    %cst_50 = arith.constant 0.000000e+00 : f32
    %58 = vector.broadcast %cst_50 : f32 to vector<288x128xf32>
    %59 = arith.maximumf %57, %58 : vector<288x128xf32>
    %c0_51 = arith.constant 0 : index
    %c0_52 = arith.constant 0 : index
    %c0_53 = arith.constant 0 : index
    %60 = vector.load %arg4[%c0_51, %c0_52, %c0_53] : memref<1x288x128xf32, #tpu.memory_space<vmem>>, vector<1x288x128xf32>
    %61 = vector.shape_cast %60 : vector<1x288x128xf32> to vector<288x128xf32>
    %62 = vector.shape_cast %59 : vector<288x128xf32> to vector<1x288x128xf32>
    tpu.vector_store %arg4[%c0_51, %c0_52, %c0_53], %62 {strides = array<i32>} : memref<1x288x128xf32, #tpu.memory_space<vmem>>, vector<1x288x128xf32>,
    return
  }
  func.func @transform_0(%arg0: i32) -> (i32, i32, i32) {
    %c0_i32 = arith.constant 0 : i32
    %c0_i32_0 = arith.constant 0 : i32
    %c0_i32_1 = arith.constant 0 : i32
    return %arg0, %c0_i32, %c0_i32_0 : i32, i32, i32
  }
  func.func @transform_1(%arg0: i32) -> (i32, i32, i32) {
    %c0_i32 = arith.constant 0 : i32
    %c0_i32_0 = arith.constant 0 : i32
    %c0_i32_1 = arith.constant 0 : i32
    %c0_i32_2 = arith.constant 0 : i32
    return %c0_i32, %c0_i32_0, %c0_i32_1 : i32, i32, i32
  }
  func.func @transform_2(%arg0: i32) -> (i32, i32) {
    %c0_i32 = arith.constant 0 : i32
    %c0_i32_0 = arith.constant 0 : i32
    %c0_i32_1 = arith.constant 0 : i32
    return %c0_i32, %c0_i32_0 : i32, i32
  }
  func.func @transform_3(%arg0: i32) -> (i32, i32, i32) {
    %c0_i32 = arith.constant 0 : i32
    %c0_i32_0 = arith.constant 0 : i32
    %c0_i32_1 = arith.constant 0 : i32
    return %arg0, %c0_i32, %c0_i32_0 : i32, i32, i32
  }
}

module attributes {stable_mosaic.version = 11 : i64} {
  func.func @_pose_transformer_kernel(%arg0: i32, %arg1: memref<34x132xf32, #tpu.memory_space<vmem>>, %arg2: memref<34x34xf32, #tpu.memory_space<vmem>>, %arg3: memref<132x128xf32, #tpu.memory_space<vmem>>, %arg4: memref<128x128xf32, #tpu.memory_space<vmem>>, %arg5: memref<128x128xf32, #tpu.memory_space<vmem>>, %arg6: memref<128x128xf32, #tpu.memory_space<vmem>>, %arg7: memref<128x128xf32, #tpu.memory_space<vmem>>, %arg8: memref<128x256xf32, #tpu.memory_space<vmem>>, %arg9: memref<256x128xf32, #tpu.memory_space<vmem>>, %arg10: memref<34x128xf32, #tpu.memory_space<vmem>>) attributes {dimension_semantics = [#tpu.dimension_semantics<arbitrary>], iteration_bounds = array<i64: 1>, scalar_prefetch = 0 : i64, scratch_operands = 0 : i64, tpu.core_type = #tpu.core_type<tc>, window_params = [{pipeline_mode = #tpu.pipeline_mode<synchronous>, transform_indices = @transform_0, window_bounds = array<i64: 34, 132>}, {pipeline_mode = #tpu.pipeline_mode<synchronous>, transform_indices = @transform_1, window_bounds = array<i64: 34, 34>}, {pipeline_mode = #tpu.pipeline_mode<synchronous>, transform_indices = @transform_2, window_bounds = array<i64: 132, 128>}, {pipeline_mode = #tpu.pipeline_mode<synchronous>, transform_indices = @transform_3, window_bounds = array<i64: 128, 128>}, {pipeline_mode = #tpu.pipeline_mode<synchronous>, transform_indices = @transform_4, window_bounds = array<i64: 128, 128>}, {pipeline_mode = #tpu.pipeline_mode<synchronous>, transform_indices = @transform_5, window_bounds = array<i64: 128, 128>}, {pipeline_mode = #tpu.pipeline_mode<synchronous>, transform_indices = @transform_6, window_bounds = array<i64: 128, 128>}, {pipeline_mode = #tpu.pipeline_mode<synchronous>, transform_indices = @transform_7, window_bounds = array<i64: 128, 256>}, {pipeline_mode = #tpu.pipeline_mode<synchronous>, transform_indices = @transform_8, window_bounds = array<i64: 256, 128>}, {pipeline_mode = #tpu.pipeline_mode<synchronous>, transform_indices = @transform_9, window_bounds = array<i64: 34, 128>}]} {
    %c0 = arith.constant 0 : index
    %c0_0 = arith.constant 0 : index
    %0 = vector.load %arg1[%c0, %c0_0] : memref<34x132xf32, #tpu.memory_space<vmem>>, vector<34x132xf32>
    %c0_1 = arith.constant 0 : index
    %c0_2 = arith.constant 0 : index
    %1 = vector.load %arg3[%c0_1, %c0_2] : memref<132x128xf32, #tpu.memory_space<vmem>>, vector<132x128xf32>
    %cst = arith.constant dense<0.000000e+00> : vector<34x128xf32>
    %2 = tpu.matmul %0, %1, %cst {dimension_numbers = #tpu.dot_dimension_numbers<[1], [0], [0], [1], [0, 0, 1, 1], [], []>} : vector<34x132xf32>, vector<132x128xf32>, vector<34x128xf32> -> vector<34x128xf32>
    %c0_3 = arith.constant 0 : index
    %c0_4 = arith.constant 0 : index
    %3 = vector.load %arg4[%c0_3, %c0_4] : memref<128x128xf32, #tpu.memory_space<vmem>>, vector<128x128xf32>
    %cst_5 = arith.constant dense<0.000000e+00> : vector<34x128xf32>
    %4 = tpu.matmul %2, %3, %cst_5 {dimension_numbers = #tpu.dot_dimension_numbers<[1], [0], [0], [1], [0, 0, 1, 1], [], []>} : vector<34x128xf32>, vector<128x128xf32>, vector<34x128xf32> -> vector<34x128xf32>
    %c0_6 = arith.constant 0 : index
    %c0_7 = arith.constant 0 : index
    %5 = vector.load %arg5[%c0_6, %c0_7] : memref<128x128xf32, #tpu.memory_space<vmem>>, vector<128x128xf32>
    %cst_8 = arith.constant dense<0.000000e+00> : vector<34x128xf32>
    %6 = tpu.matmul %2, %5, %cst_8 {dimension_numbers = #tpu.dot_dimension_numbers<[1], [0], [0], [1], [0, 0, 1, 1], [], []>} : vector<34x128xf32>, vector<128x128xf32>, vector<34x128xf32> -> vector<34x128xf32>
    %c0_9 = arith.constant 0 : index
    %c0_10 = arith.constant 0 : index
    %7 = vector.load %arg6[%c0_9, %c0_10] : memref<128x128xf32, #tpu.memory_space<vmem>>, vector<128x128xf32>
    %cst_11 = arith.constant dense<0.000000e+00> : vector<34x128xf32>
    %8 = tpu.matmul %2, %7, %cst_11 {dimension_numbers = #tpu.dot_dimension_numbers<[1], [0], [0], [1], [0, 0, 1, 1], [], []>} : vector<34x128xf32>, vector<128x128xf32>, vector<34x128xf32> -> vector<34x128xf32>
    %9 = tpu.transpose %6, [1, 0] : vector<34x128xf32> -> vector<128x34xf32>
    %cst_12 = arith.constant dense<0.000000e+00> : vector<34x34xf32>
    %10 = tpu.matmul %4, %9, %cst_12 {dimension_numbers = #tpu.dot_dimension_numbers<[1], [0], [0], [1], [0, 0, 1, 1], [], []>} : vector<34x128xf32>, vector<128x34xf32>, vector<34x34xf32> -> vector<34x34xf32>
    %cst_13 = arith.constant 0.0883883461 : f32
    %11 = vector.broadcast %cst_13 : f32 to vector<34x34xf32>
    %12 = arith.mulf %10, %11 : vector<34x34xf32>
    %c0_14 = arith.constant 0 : index
    %c0_15 = arith.constant 0 : index
    %13 = vector.load %arg2[%c0_14, %c0_15] : memref<34x34xf32, #tpu.memory_space<vmem>>, vector<34x34xf32>
    %14 = arith.addf %12, %13 : vector<34x34xf32>
    %cst_16 = arith.constant dense<0xFF800000> : vector<34xf32>
    %15 = vector.multi_reduction <maximumf>, %14, %cst_16 [1] : vector<34x34xf32> to vector<34xf32>
    %16 = vector.shape_cast %15 : vector<34xf32> to vector<34x1xf32>
    %17 = vector.broadcast %16 : vector<34x1xf32> to vector<34x34xf32>
    %18 = arith.subf %14, %17 : vector<34x34xf32>
    %19 = math.exp %18 : vector<34x34xf32>
    %cst_17 = arith.constant dense<0.000000e+00> : vector<34xf32>
    %20 = vector.multi_reduction <add>, %19, %cst_17 [1] : vector<34x34xf32> to vector<34xf32>
    %21 = vector.shape_cast %20 : vector<34xf32> to vector<34x1xf32>
    %22 = tpu.reciprocal %21 {approx = true} : vector<34x1xf32> -> vector<34x1xf32>
    %23 = vector.broadcast %22 : vector<34x1xf32> to vector<34x34xf32>
    %24 = arith.mulf %19, %23 : vector<34x34xf32>
    %cst_18 = arith.constant dense<0.000000e+00> : vector<34x128xf32>
    %25 = tpu.matmul %24, %8, %cst_18 {dimension_numbers = #tpu.dot_dimension_numbers<[1], [0], [0], [1], [0, 0, 1, 1], [], []>} : vector<34x34xf32>, vector<34x128xf32>, vector<34x128xf32> -> vector<34x128xf32>
    %c0_19 = arith.constant 0 : index
    %c0_20 = arith.constant 0 : index
    %26 = vector.load %arg7[%c0_19, %c0_20] : memref<128x128xf32, #tpu.memory_space<vmem>>, vector<128x128xf32>
    %cst_21 = arith.constant dense<0.000000e+00> : vector<34x128xf32>
    %27 = tpu.matmul %25, %26, %cst_21 {dimension_numbers = #tpu.dot_dimension_numbers<[1], [0], [0], [1], [0, 0, 1, 1], [], []>} : vector<34x128xf32>, vector<128x128xf32>, vector<34x128xf32> -> vector<34x128xf32>
    %28 = arith.addf %27, %2 : vector<34x128xf32>
    %c0_22 = arith.constant 0 : index
    %c0_23 = arith.constant 0 : index
    %29 = vector.load %arg8[%c0_22, %c0_23] : memref<128x256xf32, #tpu.memory_space<vmem>>, vector<128x256xf32>
    %cst_24 = arith.constant dense<0.000000e+00> : vector<34x256xf32>
    %30 = tpu.matmul %28, %29, %cst_24 {dimension_numbers = #tpu.dot_dimension_numbers<[1], [0], [0], [1], [0, 0, 1, 1], [], []>} : vector<34x128xf32>, vector<128x256xf32>, vector<34x256xf32> -> vector<34x256xf32>
    %cst_25 = arith.constant 0.000000e+00 : f32
    %31 = vector.broadcast %cst_25 : f32 to vector<34x256xf32>
    %32 = arith.maximumf %30, %31 : vector<34x256xf32>
    %c0_26 = arith.constant 0 : index
    %c0_27 = arith.constant 0 : index
    %33 = vector.load %arg9[%c0_26, %c0_27] : memref<256x128xf32, #tpu.memory_space<vmem>>, vector<256x128xf32>
    %cst_28 = arith.constant dense<0.000000e+00> : vector<34x128xf32>
    %34 = tpu.matmul %32, %33, %cst_28 {dimension_numbers = #tpu.dot_dimension_numbers<[1], [0], [0], [1], [0, 0, 1, 1], [], []>} : vector<34x256xf32>, vector<256x128xf32>, vector<34x128xf32> -> vector<34x128xf32>
    %35 = arith.addf %34, %28 : vector<34x128xf32>
    %c0_29 = arith.constant 0 : index
    %c0_30 = arith.constant 0 : index
    %36 = vector.load %arg10[%c0_29, %c0_30] : memref<34x128xf32, #tpu.memory_space<vmem>>, vector<34x128xf32>
    tpu.vector_store %arg10[%c0_29, %c0_30], %35 {strides = array<i32>} : memref<34x128xf32, #tpu.memory_space<vmem>>, vector<34x128xf32>,
    return
  }
  func.func @transform_0(%arg0: i32) -> (i32, i32) {
    %c0_i32 = arith.constant 0 : i32
    %c0_i32_0 = arith.constant 0 : i32
    %c0_i32_1 = arith.constant 0 : i32
    return %c0_i32, %c0_i32_0 : i32, i32
  }
  func.func @transform_1(%arg0: i32) -> (i32, i32) {
    %c0_i32 = arith.constant 0 : i32
    %c0_i32_0 = arith.constant 0 : i32
    %c0_i32_1 = arith.constant 0 : i32
    return %c0_i32, %c0_i32_0 : i32, i32
  }
  func.func @transform_2(%arg0: i32) -> (i32, i32) {
    %c0_i32 = arith.constant 0 : i32
    %c0_i32_0 = arith.constant 0 : i32
    %c0_i32_1 = arith.constant 0 : i32
    return %c0_i32, %c0_i32_0 : i32, i32
  }
  func.func @transform_3(%arg0: i32) -> (i32, i32) {
    %c0_i32 = arith.constant 0 : i32
    %c0_i32_0 = arith.constant 0 : i32
    %c0_i32_1 = arith.constant 0 : i32
    return %c0_i32, %c0_i32_0 : i32, i32
  }
  func.func @transform_4(%arg0: i32) -> (i32, i32) {
    %c0_i32 = arith.constant 0 : i32
    %c0_i32_0 = arith.constant 0 : i32
    %c0_i32_1 = arith.constant 0 : i32
    return %c0_i32, %c0_i32_0 : i32, i32
  }
  func.func @transform_5(%arg0: i32) -> (i32, i32) {
    %c0_i32 = arith.constant 0 : i32
    %c0_i32_0 = arith.constant 0 : i32
    %c0_i32_1 = arith.constant 0 : i32
    return %c0_i32, %c0_i32_0 : i32, i32
  }
  func.func @transform_6(%arg0: i32) -> (i32, i32) {
    %c0_i32 = arith.constant 0 : i32
    %c0_i32_0 = arith.constant 0 : i32
    %c0_i32_1 = arith.constant 0 : i32
    return %c0_i32, %c0_i32_0 : i32, i32
  }
  func.func @transform_7(%arg0: i32) -> (i32, i32) {
    %c0_i32 = arith.constant 0 : i32
    %c0_i32_0 = arith.constant 0 : i32
    %c0_i32_1 = arith.constant 0 : i32
    return %c0_i32, %c0_i32_0 : i32, i32
  }
  func.func @transform_8(%arg0: i32) -> (i32, i32) {
    %c0_i32 = arith.constant 0 : i32
    %c0_i32_0 = arith.constant 0 : i32
    %c0_i32_1 = arith.constant 0 : i32
    return %c0_i32, %c0_i32_0 : i32, i32
  }
  func.func @transform_9(%arg0: i32) -> (i32, i32) {
    %c0_i32 = arith.constant 0 : i32
    %c0_i32_0 = arith.constant 0 : i32
    %c0_i32_1 = arith.constant 0 : i32
    return %c0_i32, %c0_i32_0 : i32, i32
  }
}

</mosaic_0001>

<bundles_post_ra>
// kernel: volumetric_triangulation_forward.3
= control target key start
LH: loop header
LB: loop body
LE: loop exit
PB: predicated region body
PF: predicated region fallthrough
CT: control target
= control target key end

     0   :  { %v1752_v0 = vmov 0.0|0.0   ;;  %vm59_vm0 = vcmask 31744   ;;  %v1753_v48 = vmov 0.0   ;;  %vm75_vm1 = vcmask 1043456   ;;  %s2502_s2 = inlined_call_operand.vmem [shape: f32[132,128], index: 2, kind: input, shape index: {}]   ;;  %s2503_s0 = inlined_call_operand.vmem [shape: f32[34,132], index: 0, kind: input, shape index: {}]   ;;  %s2504_s3 = inlined_call_operand.vmem [shape: f32[128,128], index: 3, kind: input, shape index: {}]   ;;  %s2505_s5 = inlined_call_operand.vmem [shape: f32[128,128], index: 5, kind: input, shape index: {}]   ;;  %s2506_s4 = inlined_call_operand.vmem [shape: f32[128,128], index: 4, kind: input, shape index: {}]   ;;  %s2507_s1 = inlined_call_operand.vmem [shape: f32[34,34], index: 1, kind: input, shape index: {}]   ;;  %s2508_s6 = inlined_call_operand.vmem [shape: f32[128,128], index: 6, kind: input, shape index: {}]   ;;  %s2509_s7 = inlined_call_operand.vmem [shape: f32[128,256], index: 7, kind: input, shape index: {}]   ;;  %s2510_s8 = inlined_call_operand.vmem [shape: f32[256,128], index: 8, kind: input, shape index: {}]   ;;  %s2511_s9 = inlined_call_operand.vmem [shape: f32[34,128], index: 9, kind: output, shape index: {}]  }
   0x1   :  { %1533 = vmatprep.subr.bf16.mxu0 %v1752_v0  ;;  %v42_v1 = vld [vmem:[%s2502_s2] sm:$0xff]  ;;  %v43_v2 = vld [vmem:[%s2502_s2 + $0x8] sm:$0xff]  ;;  %v44_v3 = vld [vmem:[%s2502_s2 + $0x10] sm:$0xff]  ;;  %1557 = vmatprep.subr.bf16.mxu1 %v1752_v0  ;;  %vm1754_vm2 = vmmov 0   ;;  %vm664_vm3 = vcmask 1041408   ;;  %vm592_vm4 = vcmask 277504  }
   0x2   :  { %v1534_v4 = vpack.c.bf16 %v43_v2, %v42_v1  ;;  %v45_v5 = vld [vmem:[%s2502_s2 + $0x18] sm:$0xff]  ;;  %v46_v7 = vld [vmem:[%s2502_s2 + $0x20] sm:$0xff]  ;;  %v47_v8 = vld [vmem:[%s2502_s2 + $0x28] sm:$0xff]  ;;  %1327 = vmatprep.mubr.msk.f32.mxu1 %vm1754_vm2, %v1753_v48  ;;  %vm605_vm5 = vcmask 271360  }
   0x3   :  { %v1537_v6 = vpack.c.bf16 %v45_v5, %v44_v3  ;;  %v33_v9 = vld [vmem:[%s2503_s0 + $0x8] sm:$0xff]  ;;  %v1540_v10 = vpack.c.bf16 %v47_v8, %v46_v7  ;;  %v48_v11 = vld [vmem:[%s2502_s2 + $0x30] sm:$0xff]  ;;  %v49_v12 = vld [vmem:[%s2502_s2 + $0x38] sm:$0xff] }
   0x4   :  { %1535 = vmatpush1.bf16.msra.mxu0 %v1534_v4  ;;  %1133 = vmatprep.mubr.msk.f32.mxu0 %vm59_vm0, %v33_v9  ;;  %v169_v13 = vld [vmem:[%s2504_s3] sm:$0xff]  ;;  %v170_v14 = vld [vmem:[%s2504_s3 + $0x8] sm:$0xff]  ;;  %v171_v16 = vld [vmem:[%s2504_s3 + $0x10] sm:$0xff]  ;;  %v1543_v18 = vpack.c.bf16 %v49_v12, %v48_v11 }
   0x5   :  { %1536 = vmatprep.subr.bf16.mxu0 %v1752_v0  ;;  %v1558_v15 = vpack.c.bf16 %v170_v14, %v169_v13  ;;  %v172_v17 = vld [vmem:[%s2504_s3 + $0x18] sm:$0xff]  ;;  %v50_v19 = vld [vmem:[%s2502_s2 + $0x40] sm:$0xff]  ;;  %v51_v20 = vld [vmem:[%s2502_s2 + $0x48] sm:$0xff] }
   0x6   :  { %v1561_v21 = vpack.c.bf16 %v172_v17, %v171_v16  ;;  %v173_v22 = vld [vmem:[%s2504_s3 + $0x20] sm:$0xff]  ;;  %v174_v23 = vld [vmem:[%s2504_s3 + $0x28] sm:$0xff]  ;;  %v1546_v24 = vpack.c.bf16 %v51_v20, %v50_v19  ;;  %v52_v25 = vld [vmem:[%s2502_s2 + $0x50] sm:$0xff] }
   0x7   :  { %1559 = vmatpush3.bf16.msra.mxu1 %v1558_v15  ;;  %v53_v26 = vld [vmem:[%s2502_s2 + $0x58] sm:$0xff]  ;;  %v1564_v27 = vpack.c.bf16 %v174_v23, %v173_v22  ;;  %v175_v28 = vld [vmem:[%s2504_s3 + $0x30] sm:$0xff]  ;;  %v54_v31 = vld [vmem:[%s2502_s2 + $0x60] sm:$0xff] }
   0x8   :  { %1538 = vmatpush1.bf16.msra.mxu0 %v1537_v6  ;;  %1560 = vmatprep.subr.bf16.mxu1 %v1752_v0  ;;  %v176_v29 = vld [vmem:[%s2504_s3 + $0x38] sm:$0xff]  ;;  %v1549_v30 = vpack.c.bf16 %v53_v26, %v52_v25  ;;  %v55_v32 = vld [vmem:[%s2502_s2 + $0x68] sm:$0xff]  ;;  %v177_v34 = vld [vmem:[%s2504_s3 + $0x40] sm:$0xff] }
   0x9   :  { %1539 = vmatprep.subr.bf16.mxu0 %v1752_v0  ;;  %v1567_v33 = vpack.c.bf16 %v176_v29, %v175_v28  ;;  %v178_v35 = vld [vmem:[%s2504_s3 + $0x48] sm:$0xff]  ;;  %v1552_v36 = vpack.c.bf16 %v55_v32, %v54_v31  ;;  %v56_v37 = vld [vmem:[%s2502_s2 + $0x70] sm:$0xff]  ;;  %v57_v38 = vld [vmem:[%s2502_s2 + $0x78] sm:$0xff] }
   0xa   :  { %v1570_v39 = vpack.c.bf16 %v178_v35, %v177_v34  ;;  %v179_v40 = vld [vmem:[%s2504_s3 + $0x50] sm:$0xff]  ;;  %v180_v41 = vld [vmem:[%s2504_s3 + $0x58] sm:$0xff]  ;;  %v1555_v42 = vpack.c.bf16 %v57_v38, %v56_v37  ;;  %v381_v44 = vld [vmem:[%s2505_s5] sm:$0xff] }
   0xb   :  { %1562 = vmatpush3.bf16.msra.mxu1 %v1561_v21  ;;  %v1573_v43 = vpack.c.bf16 %v180_v41, %v179_v40  ;;  %v382_v45 = vld [vmem:[%s2505_s5 + $0x8] sm:$0xff]  ;;  %v181_v46 = vld [vmem:[%s2504_s3 + $0x60] sm:$0xff]  ;;  %v35_v52 = vld [vmem:[%s2503_s0 + $0x18] sm:$0xff] }
   0xc   :  { %1541 = vmatpush1.bf16.msra.mxu0 %v1540_v10  ;;  %1563 = vmatprep.subr.bf16.mxu1 %v1752_v0  ;;  %v182_v47 = vld [vmem:[%s2504_s3 + $0x68] sm:$0xff]  ;;  %v58_v49 = vld [vmem:[%s2502_s2 + $0x80] sm:$0xf]  ;;  %v1606_v51 = vpack.c.bf16 %v382_v45, %v381_v44  ;;  %v383_v53 = vld [vmem:[%s2505_s5 + $0x10] sm:$0xff] }
   0xd   :  { %1542 = vmatprep.subr.bf16.mxu0 %v1752_v0  ;;  %v32_v50 = vld [vmem:[%s2503_s0] sm:$0xff]  ;;  %v384_v54 = vld [vmem:[%s2505_s5 + $0x18] sm:$0xff]  ;;  %v1576_v55 = vpack.c.bf16 %v182_v47, %v181_v46  ;;  %v183_v56 = vld [vmem:[%s2504_s3 + $0x70] sm:$0xff] }
   0xe   :  { %v184_v57 = vld [vmem:[%s2504_s3 + $0x78] sm:$0xff]  ;;  %v34_v58 = vld [vmem:[%s2503_s0 + $0x10] sm:$0xff]  ;;  %v1609_v59 = vpack.c.bf16 %v384_v54, %v383_v53  ;;  %v37_v60 = vld [vmem:[%s2503_s0 + $0x28] sm:$0xff] }
   0xf   :  { %1565 = vmatpush3.bf16.msra.mxu1 %v1564_v27  ;;  %v385_v61 = vld [vmem:[%s2505_s5 + $0x20] sm:$0xff]  ;;  %v386_v62 = vld [vmem:[%s2505_s5 + $0x28] sm:$0xff]  ;;  %v1579_v63 = vpack.c.bf16 %v184_v57, %v183_v56  ;;  %v39_v3 = vld [vmem:[%s2503_s0 + $0x38] sm:$0xff] }
  0x10   :  { %1544 = vmatpush1.bf16.msra.mxu0 %v1543_v18  ;;  %1566 = vmatprep.subr.bf16.mxu1 %v1752_v0  ;;  %v36_v1 = vld [vmem:[%s2503_s0 + $0x20] sm:$0xff]  ;;  %v1612_v2 = vpack.c.bf16 %v386_v62, %v385_v61  ;;  %v387_v4 = vld [vmem:[%s2505_s5 + $0x30] sm:$0xff]  ;;  %v388_v5 = vld [vmem:[%s2505_s5 + $0x38] sm:$0xff] }
  0x11   :  { %1545 = vmatprep.subr.bf16.mxu0 %v1752_v0  ;;  %v38_v6 = vld [vmem:[%s2503_s0 + $0x30] sm:$0xff]  ;;  %v1615_v7 = vpack.c.bf16 %v388_v5, %v387_v4  ;;  %v41_v8 = vld [vmem:[%s2503_s0 + $0x48] sm:$0x3]  ;;  %v389_v9 = vld [vmem:[%s2505_s5 + $0x40] sm:$0xff] }
  0x12   :  { %v390_v10 = vld [vmem:[%s2505_s5 + $0x48] sm:$0xff]  ;;  %v40_v11 = vld [vmem:[%s2503_s0 + $0x40] sm:$0x3]  ;;  %v391_v13 = vld [vmem:[%s2505_s5 + $0x50] sm:$0xff] }
  0x13   :  { %1568 = vmatpush3.bf16.msra.mxu1 %v1567_v33  ;;  %v1618_v12 = vpack.c.bf16 %v390_v10, %v389_v9  ;;  %v392_v14 = vld [vmem:[%s2505_s5 + $0x58] sm:$0xff]  ;;  %v393_v16 = vld [vmem:[%s2505_s5 + $0x60] sm:$0xff]  ;;  %v394_v17 = vld [vmem:[%s2505_s5 + $0x68] sm:$0xff] }
  0x14   :  { %1547 = vmatpush1.bf16.msra.mxu0 %v1546_v24  ;;  %1569 = vmatprep.subr.bf16.mxu1 %v1752_v0  ;;  %v1621_v15 = vpack.c.bf16 %v392_v14, %v391_v13  ;;  %v1624_v18 = vpack.c.bf16 %v394_v17, %v393_v16  ;;  %v395_v19 = vld [vmem:[%s2505_s5 + $0x70] sm:$0xff]  ;;  %v396_v20 = vld [vmem:[%s2505_s5 + $0x78] sm:$0xff]  ;;  %v275_v22 = vld [vmem:[%s2506_s4] sm:$0xff] }
  0x15   :  { %1548 = vmatprep.subr.bf16.mxu0 %v1752_v0  ;;  %v1627_v21 = vpack.c.bf16 %v396_v20, %v395_v19  ;;  %v276_v23 = vld [vmem:[%s2506_s4 + $0x8] sm:$0xff]  ;;  %v277_v25 = vld [vmem:[%s2506_s4 + $0x10] sm:$0xff]  ;;  %v278_v26 = vld [vmem:[%s2506_s4 + $0x18] sm:$0xff] }
  0x16   :  { %v1582_v24 = vpack.c.bf16 %v276_v23, %v275_v22  ;;  %v1585_v29 = vpack.c.bf16 %v278_v26, %v277_v25  ;;  %v280_v31 = vld [vmem:[%s2506_s4 + $0x28] sm:$0xff]  ;;  %v281_v35 = vld [vmem:[%s2506_s4 + $0x30] sm:$0xff]  ;;  %v283_v40 = vld [vmem:[%s2506_s4 + $0x40] sm:$0xff] }
  0x17   :  { %1571 = vmatpush3.bf16.msra.mxu1 %v1570_v39  ;;  %v284_v41 = vld [vmem:[%s2506_s4 + $0x48] sm:$0xff]  ;;  %v285_v45 = vld [vmem:[%s2506_s4 + $0x50] sm:$0xff]  ;;  %v286_v46 = vld [vmem:[%s2506_s4 + $0x58] sm:$0xff] }
  0x18   :  { %1550 = vmatpush1.bf16.msra.mxu0 %v1549_v30  ;;  %1572 = vmatprep.subr.bf16.mxu1 %v1752_v0  ;;  %v279_v30 = vld [vmem:[%s2506_s4 + $0x20] sm:$0xff]  ;;  %v1594_v44 = vpack.c.bf16 %v284_v41, %v283_v40  ;;  %v289_v54 = vld [vmem:[%s2506_s4 + $0x70] sm:$0xff] }
  0x19   :  { %1551 = vmatprep.subr.bf16.mxu0 %v1752_v0  ;;  %v1588_v34 = vpack.c.bf16 %v280_v31, %v279_v30  ;;  %v582_v30 = vld [vmem:[%s2507_s1] sm:$0xff] }
  0x1b   :  { %1574 = vmatpush3.bf16.msra.mxu1 %v1573_v43 }
  0x1c   :  { %1553 = vmatpush1.bf16.msra.mxu0 %v1552_v36  ;;  %1575 = vmatprep.subr.bf16.mxu1 %v1752_v0  ;;  %v282_v36 = vld [vmem:[%s2506_s4 + $0x38] sm:$0xff] }
  0x1d   :  { %1554 = vmatprep.subr.bf16.mxu0 %v1752_v0  ;;  %v1591_v39 = vpack.c.bf16 %v282_v36, %v281_v35  ;;  %v583_v36 = vld [vmem:[%s2507_s1 + $0x8] sm:$0xff] }
  0x1f   :  { %1577 = vmatpush3.bf16.msra.mxu1 %v1576_v55  ;;  %v290_v55 = vld [vmem:[%s2506_s4 + $0x78] sm:$0xff] }
  0x20   :  { %1556 = vmatpush1.bf16.msra.mxu0 %v1555_v42  ;;  %1578 = vmatprep.subr.bf16.mxu1 %v1752_v0  ;;  %v1603_v56 = vpack.c.bf16 %v290_v55, %v289_v54 }
  0x21   :  { %111 = vmatprep.subr.mxu0 %v1753_v48 }
  0x23   :  { %1580 = vmatpush3.bf16.msra.mxu1 %v1579_v63 }
  0x24   :  { %1132 = vmatpush1.msk.msra.mxu0 %vm75_vm1, %v58_v49  ;;  %1581 = vmatprep.subr.bf16.mxu1 %v1752_v0 }
  0x25   :  { %144 = vmatmul.mubr.f32.vlgmr.msra.gmra.mrb[0].mxu0 %v32_v50  ;;  %1605 = vmatprep.subr.bf16.mxu0 %v1752_v0  ;;  %v1597_v50 = vpack.c.bf16 %v286_v46, %v285_v45 }
  0x26   :  { %1134 = vmatprep.mubr.msk.f32.mxu0 %vm59_vm0, %v35_v52  ;;  %1607 = vmatpush3.bf16.msra.mxu0 %v1606_v51  ;;  %v287_v51 = vld [vmem:[%s2506_s4 + $0x60] sm:$0xff]  ;;  %v288_v52 = vld [vmem:[%s2506_s4 + $0x68] sm:$0xff] }
  0x27   :  { %1608 = vmatprep.subr.bf16.mxu0 %v1752_v0  ;;  %v1600_v53 = vpack.c.bf16 %v288_v52, %v287_v51  ;;  %v585_v52 = vld [vmem:[%s2507_s1 + $0x18] sm:$0xff] }
  0x29   :  { %149 = vmatmul.mubr.f32.gmra.mrb[2].mxu0 %v34_v58 }
  0x2a   :  { %1135 = vmatprep.mubr.msk.f32.mxu0 %vm59_vm0, %v37_v60  ;;  %1610 = vmatpush3.bf16.msra.mxu0 %v1609_v59 }
  0x2b   :  { %1611 = vmatprep.subr.bf16.mxu0 %v1752_v0 }
  0x2d   :  { %154 = vmatmul.mubr.f32.gmra.mrb[4].mxu0 %v36_v1 }
  0x2e   :  { %1136 = vmatprep.mubr.msk.f32.mxu0 %vm59_vm0, %v39_v3  ;;  %1613 = vmatpush3.bf16.msra.mxu0 %v1612_v2 }
  0x2f   :  { %1614 = vmatprep.subr.bf16.mxu0 %v1752_v0 }
  0x31   :  { %159 = vmatmul.mubr.f32.gmra.mrb[6].mxu0 %v38_v6 }
  0x32   :  { %1137 = vmatprep.mubr.msk.f32.mxu0 %vm59_vm0, %v41_v8  ;;  %1616 = vmatpush3.bf16.msra.mxu0 %v1615_v7 }
  0x33   :  { %1617 = vmatprep.subr.bf16.mxu0 %v1752_v0 }
  0x35   :  { %164 = vmatmul.mubr.f32.gmra.mrb[8].mxu0 %v40_v11 }
  0x36   :  { %1619 = vmatpush3.bf16.msra.mxu0 %v1618_v12  ;;  %1421 = vmatprep.mubr.msk.f32.mxu0 %vm1754_vm2, %v1753_v48 }
  0x37   :  { %1620 = vmatprep.subr.bf16.mxu0 %v1752_v0 }
  0x3a   :  { %1622 = vmatpush3.bf16.msra.mxu0 %v1621_v15 }
  0x3b   :  { %1623 = vmatprep.subr.bf16.mxu0 %v1752_v0 }
  0x3e   :  { %1625 = vmatpush3.bf16.msra.mxu0 %v1624_v18 }
  0x3f   :  { %1626 = vmatprep.subr.bf16.mxu0 %v1752_v0 }
  0x42   :  { %1628 = vmatpush3.bf16.msra.mxu0 %v1627_v21 }
  0x43   :  { %1629 = vmatprep.subr.bf16.mxu0 %v1752_v0 }
  0xf8   :  { %v2030_v27 = vpop.f32.mrb[0].mxu0 }
  0xf9   :  { %v147_v28 = vpop.f32.mrb[1].mxu0  ;;  %1328 = vmatmul.mubr.f32.vlgmr.msra.gmra.mrb[0].mxu1 %v2030_v27  ;;  %1422 = vmatmul.mubr.f32.vlgmr.msra.gmra.mrb[10].mxu0 %v2030_v27 }
  0xfa   :  { %1583 = vmatpush3.bf16.msra.mxu1 %v1582_v24  ;;  %1424 = vmatprep.mubr.msk.f32.mxu0 %vm1754_vm2, %v1753_v48 }
  0xfb   :  { %1584 = vmatprep.subr.bf16.mxu1 %v1752_v0  ;;  %1330 = vmatprep.mubr.msk.f32.mxu1 %vm1754_vm2, %v1753_v48 }
  0xfc   :  { %v2045_v32 = vpop.f32.mrb[2].mxu0 }
  0xfd   :  { %1425 = vmatmul.mubr.f32.gmra.mrb[12].mxu0 %v2045_v32  ;;  %v152_v33 = vpop.f32.mrb[3].mxu0  ;;  %1331 = vmatmul.mubr.f32.gmra.mrb[2].mxu1 %v2045_v32 }
  0xfe   :  { %1586 = vmatpush3.bf16.msra.mxu1 %v1585_v29  ;;  %1427 = vmatprep.mubr.msk.f32.mxu0 %vm1754_vm2, %v1753_v48 }
  0xff   :  { %1587 = vmatprep.subr.bf16.mxu1 %v1752_v0  ;;  %1333 = vmatprep.mubr.msk.f32.mxu1 %vm1754_vm2, %v1753_v48 }
 0x100   :  { %v2060_v37 = vpop.f32.mrb[4].mxu0 }
 0x101   :  { %1428 = vmatmul.mubr.f32.gmra.mrb[14].mxu0 %v2060_v37  ;;  %v157_v38 = vpop.f32.mrb[5].mxu0  ;;  %1334 = vmatmul.mubr.f32.gmra.mrb[4].mxu1 %v2060_v37 }
 0x102   :  { %1589 = vmatpush3.bf16.msra.mxu1 %v1588_v34  ;;  %1430 = vmatprep.mubr.msk.f32.mxu0 %vm1754_vm2, %v1753_v48 }
 0x103   :  { %1590 = vmatprep.subr.bf16.mxu1 %v1752_v0  ;;  %1336 = vmatprep.mubr.msk.f32.mxu1 %vm1754_vm2, %v1753_v48 }
 0x104   :  { %v2075_v42 = vpop.f32.mrb[6].mxu0 }
 0x105   :  { %1431 = vmatmul.mubr.f32.gmra.mrb[16].mxu0 %v2075_v42  ;;  %v162_v43 = vpop.f32.mrb[7].mxu0  ;;  %1337 = vmatmul.mubr.f32.gmra.mrb[6].mxu1 %v2075_v42 }
 0x106   :  { %1592 = vmatpush3.bf16.msra.mxu1 %v1591_v39  ;;  %1339 = vmatprep.mubr.msk.f32.mxu1 %vm1754_vm2, %v1753_v48 }
 0x107   :  { %1593 = vmatprep.subr.bf16.mxu1 %v1752_v0  ;;  %1433 = vmatprep.mubr.msk.f32.mxu0 %vm1754_vm2, %v1753_v48 }
 0x108   :  { %v2090_v47 = vpop.f32.mrb[8].mxu0 }
 0x109   :  { %v167_v49 = vpop.f32.mrb[9].mxu0  ;;  %1340 = vmatmul.mubr.f32.gmra.mrb[8].mxu1 %v2090_v47  ;;  %1434 = vmatmul.mubr.f32.gmra.mrb[18].mxu0 %v2090_v47 }
 0x10a   :  { %1595 = vmatpush3.bf16.msra.mxu1 %v1594_v44  ;;  %1374 = vmatprep.mubr.msk.f32.mxu1 %vm1754_vm2, %v1753_v48  ;;  %v584_v44 = vld [vmem:[%s2507_s1 + $0x10] sm:$0xff] }
 0x10b   :  { %1596 = vmatprep.subr.bf16.mxu1 %v1752_v0  ;;  %1446 = vmatprep.mubr.msk.f32.mxu0 %vm1754_vm2, %v1753_v48 }
 0x10e   :  { %1598 = vmatpush3.bf16.msra.mxu1 %v1597_v50 }
 0x10f   :  { %1599 = vmatprep.subr.bf16.mxu1 %v1752_v0 }
 0x112   :  { %1601 = vmatpush3.bf16.msra.mxu1 %v1600_v53 }
 0x113   :  { %1602 = vmatprep.subr.bf16.mxu1 %v1752_v0 }
 0x116   :  { %1604 = vmatpush3.bf16.msra.mxu1 %v1603_v56 }
 0x117   :  { %1641 = vmatprep.subr.bf16.mxu1 %v1752_v0 }
 0x119   :  { %1375 = vmatmul.mubr.f32.vlgmr.msra.gmra.mrb[10].mxu1 %v2030_v27 }
 0x11a   :  { %1377 = vmatprep.mubr.msk.f32.mxu1 %vm1754_vm2, %v1753_v48 }
 0x11d   :  { %1378 = vmatmul.mubr.f32.gmra.mrb[12].mxu1 %v2045_v32 }
 0x11e   :  { %1380 = vmatprep.mubr.msk.f32.mxu1 %vm1754_vm2, %v1753_v48 }
 0x121   :  { %1381 = vmatmul.mubr.f32.gmra.mrb[14].mxu1 %v2060_v37 }
 0x122   :  { %1383 = vmatprep.mubr.msk.f32.mxu1 %vm1754_vm2, %v1753_v48 }
 0x125   :  { %1384 = vmatmul.mubr.f32.gmra.mrb[16].mxu1 %v2075_v42 }
 0x126   :  { %1386 = vmatprep.mubr.msk.f32.mxu1 %vm1754_vm2, %v1753_v48 }
 0x129   :  { %1387 = vmatmul.mubr.f32.gmra.mrb[18].mxu1 %v2090_v47 }
 0x12a   :  { %1518 = vmatprep.mubr.msk.f32.mxu1 %vm1754_vm2, %v1753_v48 }
 0x1cc   :  { %v251_v57 = vpop.f32.mrb[0].mxu1  ;;  %v463_v58 = vpop.f32.mrb[10].mxu0 }
 0x1cd   :  { %v1329_v59 = vpop.f32.mrb[1].mxu1  ;;  %v1423_v60 = vpop.f32.mrb[11].mxu0 }
 0x1d0   :  { %v468_v61 = vpop.f32.mrb[12].mxu0  ;;  %v256_v62 = vpop.f32.mrb[2].mxu1 }
 0x1d1   :  { %v1636_v63 = vpack.c.bf16 %v468_v61, %v463_v58  ;;  %v1332_v1 = vpop.f32.mrb[3].mxu1  ;;  %v1426_v2 = vpop.f32.mrb[13].mxu0  ;;  %v586_v58 = vld [vmem:[%s2507_s1 + $0x20] sm:$0x3] }
 0x1d4   :  { %v473_v3 = vpop.f32.mrb[14].mxu0  ;;  %v261_v4 = vpop.f32.mrb[4].mxu1 }
 0x1d5   :  { %v1429_v5 = vpop.f32.mrb[15].mxu0  ;;  %v1335_v6 = vpop.f32.mrb[5].mxu1 }
 0x1d8   :  { %v478_v7 = vpop.f32.mrb[16].mxu0  ;;  %v266_v8 = vpop.f32.mrb[6].mxu1 }
 0x1d9   :  { %v1639_v9 = vpack.c.bf16 %v478_v7, %v473_v3  ;;  %v1338_v10 = vpop.f32.mrb[7].mxu1  ;;  %v1432_v11 = vpop.f32.mrb[17].mxu0 }
 0x1dc   :  { %v271_v12 = vpop.f32.mrb[8].mxu1  ;;  %v483_v13 = vpop.f32.mrb[18].mxu0 }
 0x1dd   :  { %v1341_v14 = vpop.f32.mrb[9].mxu1  ;;  %v1435_v15 = vpop.f32.mrb[19].mxu0 }
 0x1ec   :  { %v357_v16 = vpop.f32.mrb[10].mxu1 }
 0x1ed   :  { %v1376_v17 = vpop.f32.mrb[11].mxu1 }
 0x1f0   :  { %v362_v18 = vpop.f32.mrb[12].mxu1 }
 0x1f1   :  { %v1630_v19 = vpack.c.bf16 %v362_v18, %v357_v16  ;;  %v1379_v20 = vpop.f32.mrb[13].mxu1 }
 0x1f3   :  { %1631 = vmatpush3.bf16.xpose.msra.mxu0 %v1630_v19 }
 0x1f4   :  { %v367_v21 = vpop.f32.mrb[14].mxu1  ;;  %1632 = vmatprep.subr.bf16.mxu0 %v1752_v0 }
 0x1f5   :  { %v1382_v22 = vpop.f32.mrb[15].mxu1 }
 0x1f8   :  { %v372_v23 = vpop.f32.mrb[16].mxu1 }
 0x1f9   :  { %v1633_v24 = vpack.c.bf16 %v372_v23, %v367_v21  ;;  %v1385_v25 = vpop.f32.mrb[17].mxu1 }
 0x1fb   :  { %1634 = vmatpush3.bf16.xpose.msra.mxu0 %v1633_v24 }
 0x1fc   :  { %v377_v26 = vpop.f32.mrb[18].mxu1  ;;  %1444 = vmatprep.subr.mxu0 %v1753_v48 }
 0x1fd   :  { %v1388_v28 = vpop.f32.mrb[19].mxu1 }
 0x1fe   :  { %v759_v28 = vld [vmem:[%s2508_s6 + $0x8] sm:$0xff] }
 0x203   :  { %1445 = vmatpush3.xpose.msra.mxu0 %v377_v26  ;;  %v758_v26 = vld [vmem:[%s2508_s6] sm:$0xff] }
 0x204   :  { %1635 = vmatprep.subr.bf16.mxu0 %v1752_v0 }
 0x206   :  { %1447 = vmatmul.mubr.f32.vlgmr.msra.gmra.mrb[20].mxu0 %v251_v57 }
 0x207   :  { %1637 = vmatpush3.bf16.msra.mxu0 %v1636_v63  ;;  %1449 = vmatprep.mubr.msk.f32.mxu0 %vm1754_vm2, %v1753_v48 }
 0x208   :  { %1638 = vmatprep.subr.bf16.mxu0 %v1752_v0 }
 0x20a   :  { %1450 = vmatmul.mubr.f32.gmra.mrb[22].mxu0 %v256_v62 }
 0x20b   :  { %1640 = vmatpush3.bf16.msra.mxu0 %v1639_v9  ;;  %1452 = vmatprep.mubr.msk.f32.mxu0 %vm1754_vm2, %v1753_v48 }
 0x20c   :  { %1469 = vmatprep.subr.mxu0 %v1753_v48 }
 0x20e   :  { %1453 = vmatmul.mubr.f32.gmra.mrb[24].mxu0 %v261_v4 }
 0x20f   :  { %1470 = vmatpush3.msk.msra.mxu0 %vm664_vm3, %v483_v13  ;;  %1455 = vmatprep.mubr.msk.f32.mxu0 %vm1754_vm2, %v1753_v48 }
 0x212   :  { %1456 = vmatmul.mubr.f32.gmra.mrb[26].mxu0 %v266_v8 }
 0x213   :  { %1458 = vmatprep.mubr.msk.f32.mxu0 %vm1754_vm2, %v1753_v48 }
 0x216   :  { %1459 = vmatmul.mubr.f32.gmra.mrb[28].mxu0 %v271_v12 }
 0x217   :  { %1471 = vmatprep.mubr.msk.f32.mxu0 %vm1754_vm2, %v1753_v48 }
 0x2d9   :  { %v553_v29 = vpop.f32.mrb[20].mxu0 }
 0x2da   :  { %v577_v31 = vmul.f32 0.088388346, %v553_v29  ;;  %v1448_v33 = vpop.f32.mrb[21].mxu0  ;;  %v760_v29 = vld [vmem:[%s2508_s6 + $0x10] sm:$0xff] }
 0x2dc   :  { %v587_v34 = vadd.f32 %v582_v30, %v577_v31  ;;  %v1642_v30 = vpack.c.bf16 %v759_v28, %v758_v26  ;;  %v761_v31 = vld [vmem:[%s2508_s6 + $0x18] sm:$0xff] }
 0x2dd   :  { %v558_v35 = vpop.f32.mrb[22].mxu0  ;;  %v1645_v33 = vpack.c.bf16 %v761_v31, %v760_v29  ;;  %v876_v29 = vld [vmem:[%s2509_s7 + $0x60] sm:$0xff]  ;;  %v881_v31 = vld [vmem:[%s2509_s7 + $0x88] sm:$0xff] }
 0x2de   :  { %v578_v38 = vmul.f32 0.088388346, %v558_v35  ;;  %v1451_v39 = vpop.f32.mrb[23].mxu0  ;;  %v593_v40 = vsel %vm592_vm4, %v587_v34, -inf  ;;  %1643 = vmatpush3.bf16.msra.mxu1 %v1642_v30  ;;  %v763_v35 = vld [vmem:[%s2508_s6 + $0x28] sm:$0xff]  ;;  %v878_v30 = vld [vmem:[%s2509_s7 + $0x70] sm:$0xff] }
 0x2df   :  { %594 = vmax.xlane.f32.xlu0 %v593_v40  ;;  %1644 = vmatprep.subr.bf16.mxu1 %v1752_v0  ;;  %v765_v39 = vld [vmem:[%s2508_s6 + $0x38] sm:$0xff] }
 0x2e0   :  { %v588_v41 = vadd.f32 %v583_v36, %v578_v38  ;;  %v764_v38 = vld [vmem:[%s2508_s6 + $0x30] sm:$0xff] }
 0x2e1   :  { %v563_v43 = vpop.f32.mrb[24].mxu0  ;;  %v1651_v40 = vpack.c.bf16 %v765_v39, %v764_v38  ;;  %v882_v38 = vld [vmem:[%s2509_s7 + $0x90] sm:$0xff]  ;;  %v885_v39 = vld [vmem:[%s2509_s7 + $0xa8] sm:$0xff] }
 0x2e2   :  { %v579_v45 = vmul.f32 0.088388346, %v563_v43  ;;  %v1454_v46 = vpop.f32.mrb[25].mxu0  ;;  %v596_v49 = vsel %vm592_vm4, %v588_v41, -inf  ;;  %1646 = vmatpush3.bf16.msra.mxu1 %v1645_v33  ;;  %v767_v43 = vld [vmem:[%s2508_s6 + $0x48] sm:$0xff]  ;;  %v883_v33 = vld [vmem:[%s2509_s7 + $0x98] sm:$0xff] }
 0x2e3   :  { %597 = vmax.xlane.f32.xlu0 %v596_v49  ;;  %1647 = vmatprep.subr.bf16.mxu1 %v1752_v0  ;;  %v769_v46 = vld [vmem:[%s2508_s6 + $0x58] sm:$0xff] }
 0x2e4   :  { %v589_v50 = vadd.f32 %v584_v44, %v579_v45  ;;  %v768_v45 = vld [vmem:[%s2508_s6 + $0x50] sm:$0xff] }
 0x2e5   :  { %v568_v51 = vpop.f32.mrb[26].mxu0  ;;  %v1657_v49 = vpack.c.bf16 %v769_v46, %v768_v45  ;;  %v886_v45 = vld [vmem:[%s2509_s7 + $0xb0] sm:$0xff]  ;;  %v889_v46 = vld [vmem:[%s2509_s7 + $0xc8] sm:$0xff] }
 0x2e6   :  { %v580_v53 = vmul.f32 0.088388346, %v568_v51  ;;  %v1457_v54 = vpop.f32.mrb[27].mxu0  ;;  %v599_v55 = vsel %vm592_vm4, %v589_v50, -inf  ;;  %v771_v51 = vld [vmem:[%s2508_s6 + $0x68] sm:$0xff] }
 0x2e7   :  { %600 = vmax.xlane.f32.xlu1 %v599_v55  ;;  %v773_v54 = vld [vmem:[%s2508_s6 + $0x78] sm:$0xff] }
 0x2e8   :  { %v590_v56 = vadd.f32 %v585_v52, %v580_v53  ;;  %v772_v53 = vld [vmem:[%s2508_s6 + $0x70] sm:$0xff] }
 0x2e9   :  { %v573_v57 = vpop.f32.mrb[28].mxu0  ;;  %v1663_v55 = vpack.c.bf16 %v773_v54, %v772_v53  ;;  %v890_v53 = vld [vmem:[%s2509_s7 + $0xd0] sm:$0xff]  ;;  %v893_v54 = vld [vmem:[%s2509_s7 + $0xe8] sm:$0xff] }
 0x2ea   :  { %v581_v59 = vmul.f32 0.088388346, %v573_v57  ;;  %v1460_v60 = vpop.f32.mrb[29].mxu0  ;;  %v602_v61 = vsel %vm592_vm4, %v590_v56, -inf }
 0x2eb   :  { %603 = vmax.xlane.f32.xlu1 %v602_v61 }
 0x2ec   :  { %v591_v62 = vadd.f32 %v586_v58, %v581_v59 }
 0x2ee   :  { %v606_v63 = vsel %vm605_vm5, %v591_v62, -inf }
 0x2ef   :  { %607 = vmax.xlane.f32.xlu0 %v606_v63 }
 0x36c   :  { %v595_v1 = vpop.xlane.xlu0 %594 }
 0x36d   :  { %v609_v2 = vsub.f32 %v587_v34, %v595_v1  ;;  %v762_v34 = vld [vmem:[%s2508_s6 + $0x20] sm:$0xff] }
 0x36e   :  { %v1648_v36 = vpack.c.bf16 %v763_v35, %v762_v34  ;;  %v1679_v34 = vpack.c.bf16 %v878_v30, %v876_v29  ;;  %v1681_v35 = vpack.c.bf16 %v883_v33, %v881_v31  ;;  %v1007_v29 = vld [vmem:[%s2510_s8 + $0x30] sm:$0xff]  ;;  %v1008_v30 = vld [vmem:[%s2510_s8 + $0x38] sm:$0xff]  ;;  %v1025_v31 = vld [vmem:[%s2510_s8 + $0xc0] sm:$0xff] }
 0x36f   :  { %v614_v3 = vmul.f32 1.442695, %v609_v2  ;;  %v1026_v33 = vld [vmem:[%s2510_s8 + $0xc8] sm:$0xff] }
 0x370   :  { %v598_v4 = vpop.xlane.xlu0 %597  ;;  %1649 = vmatpush3.bf16.msra.mxu1 %v1648_v36  ;;  %v880_v36 = vld [vmem:[%s2509_s7 + $0x80] sm:$0xff] }
 0x371   :  { %1732 = vpow2.f32 %v614_v3  ;;  %v610_v5 = vsub.f32 %v588_v41, %v598_v4  ;;  %1650 = vmatprep.subr.bf16.mxu1 %v1752_v0  ;;  %v766_v41 = vld [vmem:[%s2508_s6 + $0x40] sm:$0xff] }
 0x372   :  { %v1654_v44 = vpack.c.bf16 %v767_v43, %v766_v41  ;;  %v1683_v41 = vpack.c.bf16 %v882_v38, %v880_v36  ;;  %v1009_v36 = vld [vmem:[%s2510_s8 + $0x40] sm:$0xff]  ;;  %v1010_v38 = vld [vmem:[%s2510_s8 + $0x48] sm:$0xff] }
 0x373   :  { %v616_v6 = vmul.f32 1.442695, %v610_v5 }
 0x374   :  { %v601_v7 = vpop.xlane.xlu1 %600  ;;  %1652 = vmatpush3.bf16.msra.mxu1 %v1651_v40  ;;  %v887_v40 = vld [vmem:[%s2509_s7 + $0xb8] sm:$0xff] }
 0x375   :  { %1734 = vpow2.f32 %v616_v6  ;;  %v611_v8 = vsub.f32 %v589_v50, %v601_v7  ;;  %1653 = vmatprep.subr.bf16.mxu1 %v1752_v0  ;;  %v770_v50 = vld [vmem:[%s2508_s6 + $0x60] sm:$0xff]  ;;  %v865_v7 = vld [vmem:[%s2509_s7 + $0x8] sm:$0xff]  ;;  %v1685_v43 = vpack.c.bf16 %v887_v40, %v885_v39  ;;  %v1027_v39 = vld [vmem:[%s2510_s8 + $0xd0] sm:$0xff] }
 0x376   :  { %v1660_v52 = vpack.c.bf16 %v771_v51, %v770_v50  ;;  %v1028_v40 = vld [vmem:[%s2510_s8 + $0xd8] sm:$0xff] }
 0x377   :  { %v618_v9 = vmul.f32 1.442695, %v611_v8  ;;  %v867_v8 = vld [vmem:[%s2509_s7 + $0x18] sm:$0xff] }
 0x378   :  { %v604_v10 = vpop.xlane.xlu1 %603  ;;  %1655 = vmatpush3.bf16.msra.mxu1 %v1654_v44  ;;  %v884_v44 = vld [vmem:[%s2509_s7 + $0xa0] sm:$0xff] }
 0x379   :  { %1736 = vpow2.f32 %v618_v9  ;;  %v612_v11 = vsub.f32 %v590_v56, %v604_v10  ;;  %1656 = vmatprep.subr.bf16.mxu1 %v1752_v0  ;;  %v864_v9 = vld [vmem:[%s2509_s7] sm:$0xff]  ;;  %v1665_v10 = vpack.c.bf16 %v867_v8, %v865_v7  ;;  %v1687_v50 = vpack.c.bf16 %v886_v45, %v884_v44  ;;  %v1018_v8 = vld [vmem:[%s2510_s8 + $0x88] sm:$0xff]  ;;  %v1011_v44 = vld [vmem:[%s2510_s8 + $0x50] sm:$0xff] }
 0x37a   :  { %v1017_v7 = vld [vmem:[%s2510_s8 + $0x80] sm:$0xff]  ;;  %v1012_v45 = vld [vmem:[%s2510_s8 + $0x58] sm:$0xff] }
 0x37b   :  { %v2164_v12 = vpop.eup %1732  ;;  %v620_v13 = vmul.f32 1.442695, %v612_v11  ;;  %v866_v11 = vld [vmem:[%s2509_s7 + $0x10] sm:$0xff]  ;;  %1666 = vmatprep.subr.bf16.mxu0 %v1665_v10  ;;  %v1697_v10 = vpack.c.bf16 %v1018_v8, %v1017_v7 }
 0x37c   :  { %v608_v14 = vpop.xlane.xlu0 %607  ;;  %v624_v15 = vsel %vm592_vm4, %v2164_v12, 0.0  ;;  %1658 = vmatpush3.bf16.msra.mxu1 %v1657_v49  ;;  %v891_v49 = vld [vmem:[%s2509_s7 + $0xd8] sm:$0xff] }
 0x37d   :  { %1738 = vpow2.f32 %v620_v13  ;;  %v613_v16 = vsub.f32 %v591_v62, %v608_v14  ;;  %625 = vadd.xlane.f32.xlu1 %v624_v15  ;;  %1659 = vmatprep.subr.bf16.mxu1 %v1752_v0  ;;  %v871_v13 = vld [vmem:[%s2509_s7 + $0x38] sm:$0xff]  ;;  %v1667_v14 = vpack.c.bf16 %v866_v11, %v864_v9  ;;  %v1689_v51 = vpack.c.bf16 %v891_v49, %v889_v46  ;;  %v1001_v9 = vld [vmem:[%s2510_s8] sm:$0xff]  ;;  %v1002_v11 = vld [vmem:[%s2510_s8 + $0x8] sm:$0xff] }
 0x37e   :  { %v1029_v46 = vld [vmem:[%s2510_s8 + $0xe0] sm:$0xff]  ;;  %v1030_v49 = vld [vmem:[%s2510_s8 + $0xe8] sm:$0xff] }
 0x37f   :  { %v2168_v17 = vpop.eup %1734  ;;  %v622_v18 = vmul.f32 1.442695, %v613_v16  ;;  %v868_v16 = vld [vmem:[%s2509_s7 + $0x20] sm:$0xff] }
 0x380   :  { %v627_v19 = vsel %vm592_vm4, %v2168_v17, 0.0  ;;  %1661 = vmatpush3.bf16.msra.mxu1 %v1660_v52  ;;  %v888_v52 = vld [vmem:[%s2509_s7 + $0xc0] sm:$0xff] }
 0x381   :  { %1740 = vpow2.f32 %v622_v18  ;;  %628 = vadd.xlane.f32.xlu0 %v627_v19  ;;  %1662 = vmatprep.subr.bf16.mxu1 %v1752_v0  ;;  %v873_v18 = vld [vmem:[%s2509_s7 + $0x48] sm:$0xff]  ;;  %v875_v19 = vld [vmem:[%s2509_s7 + $0x58] sm:$0xff] }
 0x383   :  { %v2172_v20 = vpop.eup %1736 }
 0x384   :  { %v630_v21 = vsel %vm592_vm4, %v2172_v20, 0.0  ;;  %1664 = vmatpush3.bf16.msra.mxu1 %v1663_v55  ;;  %v895_v55 = vld [vmem:[%s2509_s7 + $0xf8] sm:$0xff] }
 0x385   :  { %631 = vadd.xlane.f32.xlu1 %v630_v21  ;;  %v1673_v21 = vpack.c.bf16 %v875_v19, %v873_v18  ;;  %v1021_v18 = vld [vmem:[%s2510_s8 + $0xa0] sm:$0xff]  ;;  %1698 = vmatprep.subr.bf16.mxu1 %v1697_v10  ;;  %v1022_v19 = vld [vmem:[%s2510_s8 + $0xa8] sm:$0xff] }
 0x387   :  { %v2176_v22 = vpop.eup %1738 }
 0x388   :  { %v633_v23 = vsel %vm592_vm4, %v2176_v22, 0.0 }
 0x389   :  { %634 = vadd.xlane.f32.xlu0 %v633_v23  ;;  %v874_v23 = vld [vmem:[%s2509_s7 + $0x50] sm:$0xff] }
 0x38b   :  { %v2180_v24 = vpop.eup %1740 }
 0x38c   :  { %v636_v25 = vsel %vm605_vm5, %v2180_v24, 0.0 }
 0x38d   :  { %637 = vadd.xlane.f32.xlu1 %v636_v25  ;;  %v879_v25 = vld [vmem:[%s2509_s7 + $0x78] sm:$0xff] }
 0x40a   :  { %v626_v56 = vpop.xlane.xlu1 %625 }
 0x40b   :  { %1742 = vrcp.f32 %v626_v56  ;;  %v1691_v56 = vpack.c.bf16 %v890_v53, %v888_v52  ;;  %v1013_v52 = vld [vmem:[%s2510_s8 + $0x60] sm:$0xff]  ;;  %v1014_v53 = vld [vmem:[%s2510_s8 + $0x68] sm:$0xff] }
 0x40e   :  { %v629_v57 = vpop.xlane.xlu0 %628 }
 0x40f   :  { %1744 = vrcp.f32 %v629_v57  ;;  %v1693_v57 = vpack.c.bf16 %v895_v55, %v893_v54  ;;  %v1723_v54 = vpack.c.bf16 %v1014_v53, %v1013_v52 }
 0x412   :  { %v632_v58 = vpop.xlane.xlu1 %631 }
 0x413   :  { %1746 = vrcp.f32 %v632_v58 }
 0x415   :  { %v1743_v59 = vpop.eup %1742 }
 0x416   :  { %v644_v60 = vmul.f32 %v1743_v59, %v2164_v12  ;;  %v635_v61 = vpop.xlane.xlu0 %634  ;;  %v869_v12 = vld [vmem:[%s2509_s7 + $0x28] sm:$0xff] }
 0x417   :  { %1748 = vrcp.f32 %v635_v61  ;;  %v1669_v15 = vpack.c.bf16 %v871_v13, %v869_v12  ;;  %v1019_v12 = vld [vmem:[%s2510_s8 + $0x90] sm:$0xff]  ;;  %v1020_v13 = vld [vmem:[%s2510_s8 + $0x98] sm:$0xff] }
 0x418   :  { %1472 = vmatmul.mubr.msk.f32.vlgmr.msra.gmra.mrb[30].mxu0 %vm592_vm4, %v644_v60 }
 0x419   :  { %v1745_v62 = vpop.eup %1744  ;;  %1474 = vmatprep.mubr.msk.f32.mxu0 %vm1754_vm2, %v1753_v48  ;;  %1668 = vmatpush1.bf16.msra.mxu0 %v1667_v14  ;;  %v1699_v14 = vpack.c.bf16 %v1002_v11, %v1001_v9 }
 0x41a   :  { %v638_v63 = vpop.xlane.xlu1 %637  ;;  %v645_v0 = vmul.f32 %v1745_v62, %v2168_v17  ;;  %v870_v17 = vld [vmem:[%s2509_s7 + $0x30] sm:$0xff]  ;;  %1670 = vmatprep.subr.bf16.mxu0 %v1669_v15  ;;  %v1701_v15 = vpack.c.bf16 %v1020_v13, %v1019_v12 }
 0x41b   :  { %1750 = vrcp.f32 %v638_v63 }
 0x41c   :  { %1475 = vmatmul.mubr.msk.f32.gmra.mrb[32].mxu0 %vm592_vm4, %v645_v0 }
 0x41d   :  { %v1747_v1 = vpop.eup %1746  ;;  %1477 = vmatprep.mubr.msk.f32.mxu0 %vm1754_vm2, %v1753_v48 }
 0x41e   :  { %v646_v2 = vmul.f32 %v1747_v1, %v2172_v20  ;;  %v1671_v20 = vpack.c.bf16 %v870_v17, %v868_v16  ;;  %v1003_v16 = vld [vmem:[%s2510_s8 + $0x10] sm:$0xff]  ;;  %v1004_v17 = vld [vmem:[%s2510_s8 + $0x18] sm:$0xff] }
 0x420   :  { %1478 = vmatmul.mubr.msk.f32.gmra.mrb[34].mxu0 %vm592_vm4, %v646_v2 }
 0x421   :  { %v1749_v3 = vpop.eup %1748  ;;  %1480 = vmatprep.mubr.msk.f32.mxu0 %vm1754_vm2, %v1753_v48  ;;  %1672 = vmatpush1.bf16.msra.mxu0 %v1671_v20  ;;  %v1703_v20 = vpack.c.bf16 %v1004_v17, %v1003_v16 }
 0x422   :  { %v647_v4 = vmul.f32 %v1749_v3, %v2176_v22  ;;  %v872_v22 = vld [vmem:[%s2509_s7 + $0x40] sm:$0xff]  ;;  %1674 = vmatprep.subr.bf16.mxu0 %v1673_v21  ;;  %v1705_v21 = vpack.c.bf16 %v1022_v19, %v1021_v18 }
 0x423   :  { %v1675_v26 = vpack.c.bf16 %v874_v23, %v872_v22  ;;  %v1005_v22 = vld [vmem:[%s2510_s8 + $0x20] sm:$0xff]  ;;  %v1006_v23 = vld [vmem:[%s2510_s8 + $0x28] sm:$0xff] }
 0x424   :  { %1481 = vmatmul.mubr.msk.f32.gmra.mrb[36].mxu0 %vm592_vm4, %v647_v4  ;;  %v892_v4 = vld [vmem:[%s2509_s7 + $0xe0] sm:$0xff] }
 0x425   :  { %v1751_v5 = vpop.eup %1750  ;;  %1483 = vmatprep.mubr.msk.f32.mxu0 %vm1754_vm2, %v1753_v48  ;;  %1676 = vmatpush1.bf16.msra.mxu0 %v1675_v26  ;;  %v1707_v26 = vpack.c.bf16 %v1006_v23, %v1005_v22 }
 0x426   :  { %v648_v6 = vmul.f32 %v1751_v5, %v2180_v24  ;;  %v877_v24 = vld [vmem:[%s2509_s7 + $0x68] sm:$0xff]  ;;  %v894_v5 = vld [vmem:[%s2509_s7 + $0xf0] sm:$0xff] }
 0x427   :  { %v1677_v28 = vpack.c.bf16 %v879_v25, %v877_v24  ;;  %v1023_v24 = vld [vmem:[%s2510_s8 + $0xb0] sm:$0xff]  ;;  %v1024_v25 = vld [vmem:[%s2510_s8 + $0xb8] sm:$0xff] }
 0x428   :  { %1484 = vmatmul.mubr.msk.f32.gmra.mrb[38].mxu0 %vm592_vm4, %v648_v6  ;;  %v1695_v6 = vpack.c.bf16 %v894_v5, %v892_v4  ;;  %v1015_v5 = vld [vmem:[%s2510_s8 + $0x70] sm:$0xff] }
 0x429   :  { %960 = vmatprep.mubr.f32.mxu0 %v1753_v48  ;;  %1678 = vmatprep.subr.bf16.mxu0 %v1677_v28  ;;  %v1709_v28 = vpack.c.bf16 %v1024_v25, %v1023_v24 }
 0x42a   :  { %1680 = vmatpush1.bf16.msra.mxu0 %v1679_v34  ;;  %v1711_v34 = vpack.c.bf16 %v1008_v30, %v1007_v29 }
 0x42b   :  { %1682 = vmatprep.subr.bf16.mxu0 %v1681_v35  ;;  %v1713_v35 = vpack.c.bf16 %v1026_v33, %v1025_v31 }
 0x42e   :  { %1684 = vmatpush1.bf16.msra.mxu0 %v1683_v41  ;;  %v1715_v41 = vpack.c.bf16 %v1010_v38, %v1009_v36 }
 0x42f   :  { %1686 = vmatprep.subr.bf16.mxu0 %v1685_v43  ;;  %v1717_v43 = vpack.c.bf16 %v1028_v40, %v1027_v39 }
 0x432   :  { %1688 = vmatpush1.bf16.msra.mxu0 %v1687_v50  ;;  %v1719_v50 = vpack.c.bf16 %v1012_v45, %v1011_v44 }
 0x433   :  { %1690 = vmatprep.subr.bf16.mxu0 %v1689_v51  ;;  %v1721_v51 = vpack.c.bf16 %v1030_v49, %v1029_v46 }
 0x436   :  { %1692 = vmatpush1.bf16.msra.mxu0 %v1691_v56 }
 0x437   :  { %1694 = vmatprep.subr.bf16.mxu0 %v1693_v57 }
 0x43a   :  { %1696 = vmatpush1.bf16.msra.mxu0 %v1695_v6 }
 0x4eb   :  { %v734_v58 = vpop.f32.mrb[30].mxu0 }
 0x4ec   :  { %v1473_v59 = vpop.f32.mrb[31].mxu0  ;;  %1519 = vmatmul.mubr.f32.vlgmr.msra.gmra.mrb[20].mxu1 %v734_v58 }
 0x4ed   :  { %1521 = vmatprep.mubr.msk.f32.mxu1 %vm1754_vm2, %v1753_v48  ;;  %1700 = vmatpush3.bf16.msra.mxu1 %v1699_v14 }
 0x4ee   :  { %1702 = vmatprep.subr.bf16.mxu1 %v1701_v15 }
 0x4ef   :  { %v739_v60 = vpop.f32.mrb[32].mxu0 }
 0x4f0   :  { %v1476_v61 = vpop.f32.mrb[33].mxu0  ;;  %1522 = vmatmul.mubr.f32.gmra.mrb[22].mxu1 %v739_v60 }
 0x4f1   :  { %1524 = vmatprep.mubr.msk.f32.mxu1 %vm1754_vm2, %v1753_v48  ;;  %1704 = vmatpush3.bf16.msra.mxu1 %v1703_v20 }
 0x4f2   :  { %1706 = vmatprep.subr.bf16.mxu1 %v1705_v21 }
 0x4f3   :  { %v744_v62 = vpop.f32.mrb[34].mxu0 }
 0x4f4   :  { %v1479_v63 = vpop.f32.mrb[35].mxu0  ;;  %1525 = vmatmul.mubr.f32.gmra.mrb[24].mxu1 %v744_v62 }
 0x4f5   :  { %1527 = vmatprep.mubr.msk.f32.mxu1 %vm1754_vm2, %v1753_v48  ;;  %1708 = vmatpush3.bf16.msra.mxu1 %v1707_v26 }
 0x4f6   :  { %1710 = vmatprep.subr.bf16.mxu1 %v1709_v28 }
 0x4f7   :  { %v749_v0 = vpop.f32.mrb[36].mxu0 }
 0x4f8   :  { %v1482_v1 = vpop.f32.mrb[37].mxu0  ;;  %1528 = vmatmul.mubr.f32.gmra.mrb[26].mxu1 %v749_v0 }
 0x4f9   :  { %1530 = vmatprep.mubr.msk.f32.mxu1 %vm1754_vm2, %v1753_v48  ;;  %1712 = vmatpush3.bf16.msra.mxu1 %v1711_v34 }
 0x4fa   :  { %1714 = vmatprep.subr.bf16.mxu1 %v1713_v35 }
 0x4fb   :  { %v754_v2 = vpop.f32.mrb[38].mxu0 }
 0x4fc   :  { %v1485_v3 = vpop.f32.mrb[39].mxu0  ;;  %1531 = vmatmul.mubr.f32.gmra.mrb[28].mxu1 %v754_v2 }
 0x4fd   :  { %1716 = vmatpush3.bf16.msra.mxu1 %v1715_v41  ;;  %v1031_v3 = vld [vmem:[%s2510_s8 + $0xf0] sm:$0xff] }
 0x4fe   :  { %1718 = vmatprep.subr.bf16.mxu1 %v1717_v43 }
 0x501   :  { %1720 = vmatpush3.bf16.msra.mxu1 %v1719_v50 }
 0x502   :  { %1722 = vmatprep.subr.bf16.mxu1 %v1721_v51 }
 0x505   :  { %1724 = vmatpush3.bf16.msra.mxu1 %v1723_v54 }
 0x5bf   :  { %v840_v55 = vpop.f32.mrb[20].mxu1 }
 0x5c0   :  { %v2447_v56 = vadd.f32 %v840_v55, %v2030_v27  ;;  %v1520_v57 = vpop.f32.mrb[21].mxu1 }
 0x5c2   :  { %961 = vmatmul.mubr.f32.vlgmr.msra.gmra.mrb[40].mxu0 %v2447_v56 }
 0x5c3   :  { %v845_v58 = vpop.f32.mrb[22].mxu1  ;;  %966 = vmatprep.mubr.f32.mxu0 %v1753_v48 }
 0x5c4   :  { %v2452_v59 = vadd.f32 %v845_v58, %v2045_v32  ;;  %v1523_v60 = vpop.f32.mrb[23].mxu1 }
 0x5c6   :  { %967 = vmatmul.mubr.f32.gmra.mrb[42].mxu0 %v2452_v59 }
 0x5c7   :  { %v850_v61 = vpop.f32.mrb[24].mxu1  ;;  %972 = vmatprep.mubr.f32.mxu0 %v1753_v48 }
 0x5c8   :  { %v2457_v62 = vadd.f32 %v850_v61, %v2060_v37  ;;  %v1526_v27 = vpop.f32.mrb[25].mxu1 }
 0x5ca   :  { %973 = vmatmul.mubr.f32.gmra.mrb[44].mxu0 %v2457_v62 }
 0x5cb   :  { %v855_v63 = vpop.f32.mrb[26].mxu1  ;;  %978 = vmatprep.mubr.f32.mxu0 %v1753_v48 }
 0x5cc   :  { %v2462_v0 = vadd.f32 %v855_v63, %v2075_v42  ;;  %v1529_v32 = vpop.f32.mrb[27].mxu1  ;;  %v1032_v42 = vld [vmem:[%s2510_s8 + $0xf8] sm:$0xff] }
 0x5cd   :  { %v1725_v4 = vpack.c.bf16 %v1032_v42, %v1031_v3 }
 0x5ce   :  { %979 = vmatmul.mubr.f32.gmra.mrb[46].mxu0 %v2462_v0 }
 0x5cf   :  { %v860_v1 = vpop.f32.mrb[28].mxu1  ;;  %984 = vmatprep.mubr.f32.mxu0 %v1753_v48  ;;  %v1016_v48 = vld [vmem:[%s2510_s8 + $0x78] sm:$0xff]  ;;  %1726 = vmatprep.subr.bf16.mxu1 %v1725_v4 }
 0x5d0   :  { %v2467_v2 = vadd.f32 %v860_v1, %v2090_v47  ;;  %v1532_v37 = vpop.f32.mrb[29].mxu1  ;;  %v1727_v47 = vpack.c.bf16 %v1016_v48, %v1015_v5 }
 0x5d2   :  { %985 = vmatmul.mubr.f32.gmra.mrb[48].mxu0 %v2467_v2  ;;  %1728 = vmatpush3.bf16.msra.mxu1 %v1727_v47 }
 0x695   :  { %v962_v6 = vpop.f32.mrb[40].mxu0 }
 0x696   :  { %v964_v7 = vpop.f32.mrb[41].mxu0  ;;  %v991_v9 = vmax.f32 %v962_v6, 0.0 }
 0x697   :  { %v992_v8 = vmax.f32 %v964_v7, 0.0 }
 0x699   :  { %v968_v10 = vpop.f32.mrb[42].mxu0  ;;  %1097 = vmatprep.mubr.f32.mxu1 %v992_v8 }
 0x69a   :  { %v970_v11 = vpop.f32.mrb[43].mxu0  ;;  %1098 = vmatmul.mubr.f32.vlgmr.msra.gmra.mrb[30].mxu1 %v991_v9  ;;  %v993_v13 = vmax.f32 %v968_v10, 0.0 }
 0x69b   :  { %v994_v12 = vmax.f32 %v970_v11, 0.0 }
 0x69d   :  { %v974_v14 = vpop.f32.mrb[44].mxu0  ;;  %1102 = vmatprep.mubr.f32.mxu1 %v994_v12 }
 0x69e   :  { %v976_v15 = vpop.f32.mrb[45].mxu0  ;;  %1103 = vmatmul.mubr.f32.gmra.mrb[32].mxu1 %v993_v13  ;;  %v995_v17 = vmax.f32 %v974_v14, 0.0 }
 0x69f   :  { %v996_v16 = vmax.f32 %v976_v15, 0.0 }
 0x6a1   :  { %v980_v18 = vpop.f32.mrb[46].mxu0  ;;  %1107 = vmatprep.mubr.f32.mxu1 %v996_v16 }
 0x6a2   :  { %v982_v19 = vpop.f32.mrb[47].mxu0  ;;  %1108 = vmatmul.mubr.f32.gmra.mrb[34].mxu1 %v995_v17  ;;  %v997_v21 = vmax.f32 %v980_v18, 0.0 }
 0x6a3   :  { %v998_v20 = vmax.f32 %v982_v19, 0.0 }
 0x6a5   :  { %v986_v22 = vpop.f32.mrb[48].mxu0  ;;  %1112 = vmatprep.mubr.f32.mxu1 %v998_v20 }
 0x6a6   :  { %v988_v23 = vpop.f32.mrb[49].mxu0  ;;  %1113 = vmatmul.mubr.f32.gmra.mrb[36].mxu1 %v997_v21  ;;  %v999_v25 = vmax.f32 %v986_v22, 0.0 }
 0x6a7   :  { %v1000_v24 = vmax.f32 %v988_v23, 0.0 }
 0x6a9   :  { %1117 = vmatprep.mubr.f32.mxu1 %v1000_v24 }
 0x6aa   :  { %1118 = vmatmul.mubr.f32.gmra.mrb[38].mxu1 %v999_v25 }
 0x76d   :  { %v1280_v26 = vpop.f32.mrb[30].mxu1 }
 0x76e   :  { %v1281_v28 = vpop.f32.mrb[31].mxu1 }
 0x76f   :  { %v1282_v29 = vadd.f32 %v1281_v28, %v1280_v26 }
 0x771   :  { %v1100_v30 = vadd.f32 %v1282_v29, %v2447_v56  ;;  %v1283_v31 = vpop.f32.mrb[32].mxu1 }
 0x772   :  { %v1284_v33 = vpop.f32.mrb[33].mxu1 }
 0x773   :  { %1123 = vst [vmem:[%s2511_s9] sm:$0xff] %v1100_v30  ;;  %v1285_v34 = vadd.f32 %v1284_v33, %v1283_v31 }
 0x775   :  { %v1105_v35 = vadd.f32 %v1285_v34, %v2452_v59  ;;  %v1286_v36 = vpop.f32.mrb[34].mxu1 }
 0x776   :  { %v1287_v38 = vpop.f32.mrb[35].mxu1 }
 0x777   :  { %1124 = vst [vmem:[%s2511_s9 + $0x8] sm:$0xff] %v1105_v35  ;;  %v1288_v39 = vadd.f32 %v1287_v38, %v1286_v36 }
 0x779   :  { %v1110_v40 = vadd.f32 %v1288_v39, %v2457_v62  ;;  %v1289_v41 = vpop.f32.mrb[36].mxu1 }
 0x77a   :  { %v1290_v43 = vpop.f32.mrb[37].mxu1 }
 0x77b   :  { %1125 = vst [vmem:[%s2511_s9 + $0x10] sm:$0xff] %v1110_v40  ;;  %v1291_v44 = vadd.f32 %v1290_v43, %v1289_v41 }
 0x77d   :  { %v1115_v45 = vadd.f32 %v1291_v44, %v2462_v0  ;;  %v1292_v46 = vpop.f32.mrb[38].mxu1 }
 0x77e   :  { %v1293_v49 = vpop.f32.mrb[39].mxu1 }
 0x77f   :  { %1126 = vst [vmem:[%s2511_s9 + $0x18] sm:$0xff] %v1115_v45  ;;  %v1294_v50 = vadd.f32 %v1293_v49, %v1292_v46 }
 0x781   :  { %v1120_v51 = vadd.f32 %v1294_v50, %v2467_v2 }
 0x783   :  { %1127 = vst [vmem:[%s2511_s9 + $0x20] sm:$0x3] %v1120_v51 }

// kernel: volumetric_triangulation_forward.2
= control target key start
LH: loop header
LB: loop body
LE: loop exit
PB: predicated region body
PF: predicated region fallthrough
CT: control target
= control target key end

     0   :  { %s5656_s12 = smov 0   ;;  %s6701_s0 = inlined_call_operand.vmem [shape: f32[2,342,3], index: 0, kind: input, shape index: {}]   ;;  %s6702_s1 = inlined_call_operand.vmem [shape: f32[9,3,128], index: 1, kind: input, shape index: {}]   ;;  %s6703_s2 = inlined_call_operand.vmem [shape: f32[1,128], index: 2, kind: input, shape index: {}]   ;;  %s6704_s3 = inlined_call_operand.vmem [shape: f32[2,288,128], index: 3, kind: output, shape index: {}]  }
   0x1 LB: > { %s4140_s13 = sadd.s32 4294967295, %s5634_s12   ;;  %p4144_p0 = scmp.ge.s32.totalorder %s5634_s12, 1  ;;  %s5634_s12 = sphi %s5656_s12, %s13_s12  }
   0x2   : > { %p137_p1 = scmp.lt.s32.totalorder %s5634_s12, 3 }
   0x4   : > { %p138_p2 = pnand %p4144_p0, %p137_p1 }
   0x5   : > { %v4147_v0 = vld [vmem:[%s6702_s1 + $0x4] sm:$0x7] (!%p138_p2)  ;;  %vm355_vm0 = vcmask (!%p138_p2), 1042432   ;;  %v5670_v1 = vld [vmem:[%s6702_s1 + $0x10] sm:$0x7] (!%p138_p2)  ;;  %p161_p3 = scmp.lt.s32.totalorder (!%p138_p2), %s4140_s13, 1 }
   0x6   : > { %141 = sbr.rel (%p138_p2) target bundleno = 559 (0x22f), region = 32  ;;  %4824 = vmatprep.subr.msk.mxu1 (!%p138_p2), %vm355_vm0, %v4147_v0  ;;  %5048 = vmatprep.subr.msk.mxu0 (!%p138_p2), %vm355_vm0, %v5670_v1  ;;  %v207_v2 = vld [vmem:[%s6702_s1] sm:$0x7] (!%p138_p2)  ;;  %v4336_v3 = vld [vmem:[%s6702_s1 + $0x14] sm:$0x7] (!%p138_p2)  ;;  %vm246_vm1 = vcmask (!%p138_p2), 23552  }
   0x7   : > { %4825 = vmatpush3.msk.msra.mxu1 (!%p138_p2), %vm355_vm0, %v4147_v0  ;;  %5049 = vmatpush3.msk.msra.mxu0 (!%p138_p2), %vm355_vm0, %v5670_v1  ;;  %v5707_v10 = vld [vmem:[%s6702_s1 + $0x18] sm:$0x7] (!%p138_p2)  ;;  %v5712_v11 = vld [vmem:[%s6702_s1 + $0x8] sm:$0x7] (!%p138_p2)  ;;  %v5795_v48 = vld [vmem:[%s6702_s1 + $0x1c] sm:$0x7] (!%p138_p2) }
   0x8   : > { %4880 = vmatprep.subr.msk.mxu1 (!%p138_p2), %vm355_vm0, %v207_v2  ;;  %5104 = vmatprep.subr.msk.mxu0 (!%p138_p2), %vm355_vm0, %v4336_v3 }
   0xd   : > { %s6706_s13 = smov (!%p161_p3, %s4140_s13), 1 }
   0xe   : > { %s5618_s22 = smul.u32 344, %s6706_s13 }
   0xf   : > { %s5619_s9 = smul.u32 288, %s6706_s13 }
  0x10   : > { %s5692_s25 = scalar_lea.vmem %s6701_s0, %s5618_s22 }
  0x11   : > { %v208_v4 = vld [vmem:[%s5692_s25 + $0x1] sm:$0xff]  ;;  %v1820_v5 = vld [vmem:[%s5692_s25 + $0x13] sm:$0xff]  ;;  %v209_v6 = vld [vmem:[%s5692_s25 + $0x9] sm:$0xff]  ;;  %s6619_s16 = scalar_lea.vmem %s6704_s3, %s5619_s9 }
  0x12   : > { %4826 = vmatprep.mubr.msk.f32.mxu1 %vm246_vm1, %v208_v4  ;;  %5050 = vmatprep.mubr.msk.f32.mxu0 %vm246_vm1, %v1820_v5  ;;  %v1821_v7 = vld [vmem:[%s5692_s25 + $0x1b] sm:$0xff]  ;;  %v210_v8 = vld [vmem:[%s5692_s25 + $0x11] sm:$0xff]  ;;  %v1822_v9 = vld [vmem:[%s5692_s25 + $0x23] sm:$0xff] }
  0x13   : > { %4827 = vmatmul.mubr.msk.f32.vlgmr.msra.gmra.mrb[0].mxu1 %vm246_vm1, %v209_v6  ;;  %5051 = vmatmul.mubr.msk.f32.vlgmr.msra.gmra.mrb[0].mxu0 %vm246_vm1, %v1821_v7  ;;  %v211_v12 = vld [vmem:[%s5692_s25 + $0x19] sm:$0xff]  ;;  %v1823_v13 = vld [vmem:[%s5692_s25 + $0x2b] sm:$0xff]  ;;  %v212_v14 = vld [vmem:[%s5692_s25 + $0x21] sm:$0xff] }
  0x14   : > { %4881 = vmatpush3.msk.msra.mxu1 %vm355_vm0, %v207_v2  ;;  %5105 = vmatpush3.msk.msra.mxu0 %vm355_vm0, %v4336_v3  ;;  %v1824_v15 = vld [vmem:[%s5692_s25 + $0x33] sm:$0xff]  ;;  %v213_v16 = vld [vmem:[%s5692_s25 + $0x29] sm:$0xff]  ;;  %v1825_v17 = vld [vmem:[%s5692_s25 + $0x3b] sm:$0xff] }
  0x15   : > { %4829 = vmatprep.mubr.msk.f32.mxu1 %vm246_vm1, %v210_v8  ;;  %5053 = vmatprep.mubr.msk.f32.mxu0 %vm246_vm1, %v1822_v9  ;;  %v214_v18 = vld [vmem:[%s5692_s25 + $0x31] sm:$0xff]  ;;  %v1826_v19 = vld [vmem:[%s5692_s25 + $0x43] sm:$0xff]  ;;  %v215_v20 = vld [vmem:[%s5692_s25 + $0x39] sm:$0xff] }
  0x16   : > { %5160 = vmatprep.subr.msk.mxu0 %vm355_vm0, %v5707_v10  ;;  %4936 = vmatprep.subr.msk.mxu1 %vm355_vm0, %v5712_v11  ;;  %v1827_v21 = vld [vmem:[%s5692_s25 + $0x4b] sm:$0xff]  ;;  %v216_v22 = vld [vmem:[%s5692_s25 + $0x41] sm:$0xff]  ;;  %v1828_v23 = vld [vmem:[%s5692_s25 + $0x53] sm:$0xff] }
  0x17   : > { %4830 = vmatmul.mubr.msk.f32.gmra.mrb[2].mxu1 %vm246_vm1, %v211_v12  ;;  %5054 = vmatmul.mubr.msk.f32.gmra.mrb[2].mxu0 %vm246_vm1, %v1823_v13  ;;  %v217_v24 = vld [vmem:[%s5692_s25 + $0x49] sm:$0xff]  ;;  %v1829_v25 = vld [vmem:[%s5692_s25 + $0x5b] sm:$0xff]  ;;  %v218_v26 = vld [vmem:[%s5692_s25 + $0x51] sm:$0xff] }
  0x18   : > { %4832 = vmatprep.mubr.msk.f32.mxu1 %vm246_vm1, %v212_v14  ;;  %5056 = vmatprep.mubr.msk.f32.mxu0 %vm246_vm1, %v1824_v15  ;;  %v1830_v27 = vld [vmem:[%s5692_s25 + $0x63] sm:$0xff]  ;;  %v219_v28 = vld [vmem:[%s5692_s25 + $0x59] sm:$0xff]  ;;  %v1831_v29 = vld [vmem:[%s5692_s25 + $0x6b] sm:$0xff] }
  0x19   : > { %v220_v30 = vld [vmem:[%s5692_s25 + $0x61] sm:$0xff]  ;;  %v1832_v31 = vld [vmem:[%s5692_s25 + $0x73] sm:$0xff]  ;;  %v221_v32 = vld [vmem:[%s5692_s25 + $0x69] sm:$0xff] }
  0x1a   : > { %v1833_v33 = vld [vmem:[%s5692_s25 + $0x7b] sm:$0xff]  ;;  %v222_v34 = vld [vmem:[%s5692_s25 + $0x71] sm:$0xff]  ;;  %v1834_v35 = vld [vmem:[%s5692_s25 + $0x83] sm:$0xff] }
  0x1b   : > { %4833 = vmatmul.mubr.msk.f32.gmra.mrb[4].mxu1 %vm246_vm1, %v213_v16  ;;  %5057 = vmatmul.mubr.msk.f32.gmra.mrb[4].mxu0 %vm246_vm1, %v1825_v17  ;;  %v223_v36 = vld [vmem:[%s5692_s25 + $0x79] sm:$0xff]  ;;  %v1835_v37 = vld [vmem:[%s5692_s25 + $0x8b] sm:$0xff]  ;;  %v224_v38 = vld [vmem:[%s5692_s25 + $0x81] sm:$0xff] }
  0x1c   : > { %4835 = vmatprep.mubr.msk.f32.mxu1 %vm246_vm1, %v214_v18  ;;  %5059 = vmatprep.mubr.msk.f32.mxu0 %vm246_vm1, %v1826_v19  ;;  %v1836_v39 = vld [vmem:[%s5692_s25 + $0x93] sm:$0xff]  ;;  %v225_v40 = vld [vmem:[%s5692_s25 + $0x89] sm:$0xff]  ;;  %v1837_v41 = vld [vmem:[%s5692_s25 + $0x9b] sm:$0xff] }
  0x1d   : > { %v226_v42 = vld [vmem:[%s5692_s25 + $0x91] sm:$0xff]  ;;  %v227_v44 = vld [vmem:[%s5692_s25 + $0x99] sm:$0xff]  ;;  %v228_v46 = vld [vmem:[%s5692_s25 + $0xa1] sm:$0xff] }
  0x1e   : > { %v2250_v43 = vld [vmem:[%s5692_s25 + $0x14] sm:$0xff]  ;;  %v2251_v45 = vld [vmem:[%s5692_s25 + $0x1c] sm:$0xff]  ;;  %v5790_v47 = vld [vmem:[%s5692_s25 + $0x24] sm:$0xff] }
  0x1f   : > { %4836 = vmatmul.mubr.msk.f32.gmra.mrb[6].mxu1 %vm246_vm1, %v215_v20  ;;  %5060 = vmatmul.mubr.msk.f32.gmra.mrb[6].mxu0 %vm246_vm1, %v1827_v21  ;;  %v229_v49 = vld [vmem:[%s5692_s25 + $0xa9] sm:$0xff]  ;;  %v230_v51 = vld [vmem:[%s5692_s25 + $0xb1] sm:$0xff]  ;;  %v231_v53 = vld [vmem:[%s5692_s25 + $0xb9] sm:$0xff] }
  0x20   : > { %4838 = vmatprep.mubr.msk.f32.mxu1 %vm246_vm1, %v216_v22  ;;  %5062 = vmatprep.mubr.msk.f32.mxu0 %vm246_vm1, %v1828_v23  ;;  %v5804_v50 = vld [vmem:[%s5692_s25 + $0x2c] sm:$0xff]  ;;  %v5810_v52 = vld [vmem:[%s5692_s25 + $0x34] sm:$0xff]  ;;  %v5822_v54 = vld [vmem:[%s5692_s25 + $0x3c] sm:$0xff] }
  0x21   : > { %v232_v55 = vld [vmem:[%s5692_s25 + $0xc1] sm:$0xff]  ;;  %v233_v57 = vld [vmem:[%s5692_s25 + $0xc9] sm:$0xff]  ;;  %v234_v59 = vld [vmem:[%s5692_s25 + $0xd1] sm:$0xff] }
  0x22   : > { %v5826_v56 = vld [vmem:[%s5692_s25 + $0x44] sm:$0xff]  ;;  %v5836_v58 = vld [vmem:[%s5692_s25 + $0x4c] sm:$0xff]  ;;  %v5840_v60 = vld [vmem:[%s5692_s25 + $0x54] sm:$0xff] }
  0x23   : > { %4839 = vmatmul.mubr.msk.f32.gmra.mrb[8].mxu1 %vm246_vm1, %v217_v24  ;;  %5063 = vmatmul.mubr.msk.f32.gmra.mrb[8].mxu0 %vm246_vm1, %v1829_v25  ;;  %v235_v61 = vld [vmem:[%s5692_s25 + $0xd9] sm:$0xff]  ;;  %v236_v63 = vld [vmem:[%s5692_s25 + $0xe1] sm:$0xff]  ;;  %v237_v2 = vld [vmem:[%s5692_s25 + $0xe9] sm:$0xff] }
  0x24   : > { %4841 = vmatprep.mubr.msk.f32.mxu1 %vm246_vm1, %v218_v26  ;;  %5065 = vmatprep.mubr.msk.f32.mxu0 %vm246_vm1, %v1830_v27  ;;  %v5850_v62 = vld [vmem:[%s5692_s25 + $0x5c] sm:$0xff]  ;;  %v5854_v0 = vld [vmem:[%s5692_s25 + $0x64] sm:$0xff]  ;;  %v5864_v3 = vld [vmem:[%s5692_s25 + $0x6c] sm:$0xff] }
  0x25   : > { %v238_v4 = vld [vmem:[%s5692_s25 + $0xf1] sm:$0xff]  ;;  %v239_v6 = vld [vmem:[%s5692_s25 + $0xf9] sm:$0xff]  ;;  %v240_v8 = vld [vmem:[%s5692_s25 + $0x101] sm:$0xff] }
  0x26   : > { %v5868_v5 = vld [vmem:[%s5692_s25 + $0x74] sm:$0xff]  ;;  %v5878_v7 = vld [vmem:[%s5692_s25 + $0x7c] sm:$0xff]  ;;  %v5882_v9 = vld [vmem:[%s5692_s25 + $0x84] sm:$0xff] }
  0x27   : > { %4842 = vmatmul.mubr.msk.f32.gmra.mrb[10].mxu1 %vm246_vm1, %v219_v28  ;;  %5066 = vmatmul.mubr.msk.f32.gmra.mrb[10].mxu0 %vm246_vm1, %v1831_v29  ;;  %v5892_v12 = vld [vmem:[%s5692_s25 + $0x8c] sm:$0xff]  ;;  %v5896_v14 = vld [vmem:[%s5692_s25 + $0x94] sm:$0xff]  ;;  %v5906_v16 = vld [vmem:[%s5692_s25 + $0x9c] sm:$0xff] }
  0x28   : > { %4844 = vmatprep.mubr.msk.f32.mxu1 %vm246_vm1, %v220_v30  ;;  %5068 = vmatprep.mubr.msk.f32.mxu0 %vm246_vm1, %v1832_v31  ;;  %v242_v13 = vld [vmem:[%s5692_s25 + $0x111] sm:$0xff]  ;;  %v243_v15 = vld [vmem:[%s5692_s25 + $0x119] sm:$0xff]  ;;  %v5910_v18 = vld [vmem:[%s5692_s25 + $0xa4] sm:$0xff] }
  0x29   : > { %v171_v17 = vld [vmem:[%s5692_s25] sm:$0xff]  ;;  %v172_v19 = vld [vmem:[%s5692_s25 + $0x8] sm:$0xff]  ;;  %v173_v21 = vld [vmem:[%s5692_s25 + $0x10] sm:$0xff] }
  0x2a   : > { %v5920_v20 = vld [vmem:[%s5692_s25 + $0xac] sm:$0xff]  ;;  %v5924_v22 = vld [vmem:[%s5692_s25 + $0xb4] sm:$0xff]  ;;  %v5939_v25 = vld [vmem:[%s5692_s25 + $0xbc] sm:$0xff] }
  0x2b   : > { %4845 = vmatmul.mubr.msk.f32.gmra.mrb[12].mxu1 %vm246_vm1, %v221_v32  ;;  %5069 = vmatmul.mubr.msk.f32.gmra.mrb[12].mxu0 %vm246_vm1, %v1833_v33  ;;  %v5929_v23 = vld [vmem:[%s6702_s1 + $0xc] sm:$0x7]  ;;  %v174_v24 = vld [vmem:[%s5692_s25 + $0x18] sm:$0xff]  ;;  %v175_v26 = vld [vmem:[%s5692_s25 + $0x20] sm:$0xff] }
  0x2c   : > { %4847 = vmatprep.mubr.msk.f32.mxu1 %vm246_vm1, %v222_v34  ;;  %5071 = vmatprep.mubr.msk.f32.mxu0 %vm246_vm1, %v1834_v35  ;;  %v5945_v27 = vld [vmem:[%s5692_s25 + $0xc4] sm:$0xff]  ;;  %v5957_v28 = vld [vmem:[%s5692_s25 + $0xcc] sm:$0xff]  ;;  %v5961_v30 = vld [vmem:[%s5692_s25 + $0xd4] sm:$0xff] }
  0x2d   : > { %v177_v29 = vld [vmem:[%s5692_s25 + $0x30] sm:$0xff]  ;;  %v178_v31 = vld [vmem:[%s5692_s25 + $0x38] sm:$0xff]  ;;  %v179_v33 = vld [vmem:[%s5692_s25 + $0x40] sm:$0xff] }
  0x2e   : > { %v5971_v32 = vld [vmem:[%s5692_s25 + $0xdc] sm:$0xff]  ;;  %v5975_v34 = vld [vmem:[%s5692_s25 + $0xe4] sm:$0xff] }
  0x2f   : > { %4848 = vmatmul.mubr.msk.f32.gmra.mrb[14].mxu1 %vm246_vm1, %v223_v36  ;;  %5072 = vmatmul.mubr.msk.f32.gmra.mrb[14].mxu0 %vm246_vm1, %v1835_v37  ;;  %v180_v35 = vld [vmem:[%s5692_s25 + $0x48] sm:$0xff]  ;;  %v181_v37 = vld [vmem:[%s5692_s25 + $0x50] sm:$0xff] }
  0x30   : > { %4850 = vmatprep.mubr.msk.f32.mxu1 %vm246_vm1, %v224_v38  ;;  %5074 = vmatprep.mubr.msk.f32.mxu0 %vm246_vm1, %v1836_v39  ;;  %v5985_v36 = vld [vmem:[%s5692_s25 + $0xec] sm:$0xff]  ;;  %v5989_v38 = vld [vmem:[%s5692_s25 + $0xf4] sm:$0xff] }
  0x31   : > { %v182_v39 = vld [vmem:[%s5692_s25 + $0x58] sm:$0xff] }
  0x33   : > { %4851 = vmatmul.mubr.msk.f32.gmra.mrb[16].mxu1 %vm246_vm1, %v225_v40  ;;  %5075 = vmatmul.mubr.msk.f32.gmra.mrb[16].mxu0 %vm246_vm1, %v1837_v41  ;;  %v5999_v40 = vld [vmem:[%s5692_s25 + $0xfc] sm:$0xff] }
  0x34   : > { %4853 = vmatprep.mubr.msk.f32.mxu1 %vm246_vm1, %v226_v42  ;;  %5106 = vmatprep.mubr.msk.f32.mxu0 %vm246_vm1, %v2250_v43  ;;  %v183_v41 = vld [vmem:[%s5692_s25 + $0x60] sm:$0xff]  ;;  %v184_v43 = vld [vmem:[%s5692_s25 + $0x68] sm:$0xff] }
  0x35   : > { %v6003_v42 = vld [vmem:[%s5692_s25 + $0x104] sm:$0xff] }
  0x37   : > { %4854 = vmatmul.mubr.msk.f32.gmra.mrb[18].mxu1 %vm246_vm1, %v227_v44  ;;  %5107 = vmatmul.mubr.msk.f32.vlgmr.msra.gmra.mrb[0].mxu0 %vm246_vm1, %v2251_v45  ;;  %v6013_v44 = vld [vmem:[%s5692_s25 + $0x10c] sm:$0xff] }
  0x38   : > { %5161 = vmatpush3.msk.msra.mxu0 %vm355_vm0, %v5707_v10  ;;  %4856 = vmatprep.mubr.msk.f32.mxu1 %vm246_vm1, %v228_v46  ;;  %v241_v10 = vld [vmem:[%s5692_s25 + $0x109] sm:$0xff]  ;;  %v6017_v46 = vld [vmem:[%s5692_s25 + $0x114] sm:$0xff] }
  0x39   : > { %5109 = vmatprep.mubr.msk.f32.mxu0 %vm246_vm1, %v5790_v47  ;;  %5216 = vmatprep.subr.msk.mxu0 %vm355_vm0, %v5795_v48  ;;  %v185_v45 = vld [vmem:[%s5692_s25 + $0x70] sm:$0xff] }
  0x3b   : > { %4857 = vmatmul.mubr.msk.f32.gmra.mrb[20].mxu1 %vm246_vm1, %v229_v49  ;;  %5110 = vmatmul.mubr.msk.f32.gmra.mrb[2].mxu0 %vm246_vm1, %v5804_v50  ;;  %v186_v49 = vld [vmem:[%s5692_s25 + $0x78] sm:$0xff] }
  0x3c   : > { %4859 = vmatprep.mubr.msk.f32.mxu1 %vm246_vm1, %v230_v51  ;;  %5112 = vmatprep.mubr.msk.f32.mxu0 %vm246_vm1, %v5810_v52  ;;  %v6027_v51 = vld [vmem:[%s5692_s25 + $0x11c] sm:$0xff] }
  0x3f   : > { %4860 = vmatmul.mubr.msk.f32.gmra.mrb[22].mxu1 %vm246_vm1, %v231_v53  ;;  %5113 = vmatmul.mubr.msk.f32.gmra.mrb[4].mxu0 %vm246_vm1, %v5822_v54  ;;  %v187_v53 = vld [vmem:[%s5692_s25 + $0x80] sm:$0xff] }
  0x40   : > { %4862 = vmatprep.mubr.msk.f32.mxu1 %vm246_vm1, %v232_v55  ;;  %5115 = vmatprep.mubr.msk.f32.mxu0 %vm246_vm1, %v5826_v56  ;;  %v6031_v55 = vld [vmem:[%s5692_s25 + $0x124] sm:$0xff] }
  0x43   : > { %4863 = vmatmul.mubr.msk.f32.gmra.mrb[24].mxu1 %vm246_vm1, %v233_v57  ;;  %5116 = vmatmul.mubr.msk.f32.gmra.mrb[6].mxu0 %vm246_vm1, %v5836_v58  ;;  %v188_v57 = vld [vmem:[%s5692_s25 + $0x88] sm:$0xff] }
  0x44   : > { %4865 = vmatprep.mubr.msk.f32.mxu1 %vm246_vm1, %v234_v59  ;;  %5118 = vmatprep.mubr.msk.f32.mxu0 %vm246_vm1, %v5840_v60  ;;  %v6041_v59 = vld [vmem:[%s5692_s25 + $0x12c] sm:$0xff] }
  0x47   : > { %4866 = vmatmul.mubr.msk.f32.gmra.mrb[26].mxu1 %vm246_vm1, %v235_v61  ;;  %5119 = vmatmul.mubr.msk.f32.gmra.mrb[8].mxu0 %vm246_vm1, %v5850_v62  ;;  %v189_v61 = vld [vmem:[%s5692_s25 + $0x90] sm:$0xff] }
  0x48   : > { %4868 = vmatprep.mubr.msk.f32.mxu1 %vm246_vm1, %v236_v63  ;;  %5121 = vmatprep.mubr.msk.f32.mxu0 %vm246_vm1, %v5854_v0  ;;  %v190_v63 = vld [vmem:[%s5692_s25 + $0x98] sm:$0xff] }
  0x4b   : > { %4869 = vmatmul.mubr.msk.f32.gmra.mrb[28].mxu1 %vm246_vm1, %v237_v2  ;;  %5122 = vmatmul.mubr.msk.f32.gmra.mrb[10].mxu0 %vm246_vm1, %v5864_v3  ;;  %v191_v2 = vld [vmem:[%s5692_s25 + $0xa0] sm:$0xff] }
  0x4c   : > { %4871 = vmatprep.mubr.msk.f32.mxu1 %vm246_vm1, %v238_v4  ;;  %5124 = vmatprep.mubr.msk.f32.mxu0 %vm246_vm1, %v5868_v5  ;;  %v6055_v4 = vld [vmem:[%s6702_s1 + $0x20] sm:$0x7] }
  0x4f   : > { %4872 = vmatmul.mubr.msk.f32.gmra.mrb[30].mxu1 %vm246_vm1, %v239_v6  ;;  %5125 = vmatmul.mubr.msk.f32.gmra.mrb[12].mxu0 %vm246_vm1, %v5878_v7  ;;  %v193_v6 = vld [vmem:[%s5692_s25 + $0xb0] sm:$0xff] }
  0x50   : > { %4874 = vmatprep.mubr.msk.f32.mxu1 %vm246_vm1, %v240_v8  ;;  %5127 = vmatprep.mubr.msk.f32.mxu0 %vm246_vm1, %v5882_v9  ;;  %v206_v8 = vld [vmem:[%s5692_s25 + $0x118] sm:$0xff] }
  0x53   : > { %4875 = vmatmul.mubr.msk.f32.gmra.mrb[32].mxu1 %vm246_vm1, %v241_v10  ;;  %5128 = vmatmul.mubr.msk.f32.gmra.mrb[14].mxu0 %vm246_vm1, %v5892_v12  ;;  %v961_v10 = vld [vmem:[%s5692_s25 + $0xa] sm:$0xff] }
  0x54   : > { %4877 = vmatprep.mubr.msk.f32.mxu1 %vm246_vm1, %v242_v13  ;;  %5130 = vmatprep.mubr.msk.f32.mxu0 %vm246_vm1, %v5896_v14  ;;  %v6143_v13 = vld [vmem:[%s5692_s25 + $0x1a] sm:$0xff] }
  0x57   : > { %4878 = vmatmul.mubr.msk.f32.gmra.mrb[34].mxu1 %vm246_vm1, %v243_v15  ;;  %5131 = vmatmul.mubr.msk.f32.gmra.mrb[16].mxu0 %vm246_vm1, %v5906_v16  ;;  %v6161_v15 = vld [vmem:[%s5692_s25 + $0x2a] sm:$0xff] }
  0x58   : > { %4882 = vmatprep.mubr.msk.f32.mxu1 %vm246_vm1, %v171_v17  ;;  %5133 = vmatprep.mubr.msk.f32.mxu0 %vm246_vm1, %v5910_v18  ;;  %v6175_v17 = vld [vmem:[%s5692_s25 + $0x3a] sm:$0xff] }
  0x5b   : > { %4883 = vmatmul.mubr.msk.f32.vlgmr.msra.gmra.mrb[0].mxu1 %vm246_vm1, %v172_v19  ;;  %5134 = vmatmul.mubr.msk.f32.gmra.mrb[18].mxu0 %vm246_vm1, %v5920_v20  ;;  %v6189_v19 = vld [vmem:[%s5692_s25 + $0x4a] sm:$0xff] }
  0x5c   : > { %4937 = vmatpush3.msk.msra.mxu1 %vm355_vm0, %v5712_v11  ;;  %4885 = vmatprep.mubr.msk.f32.mxu1 %vm246_vm1, %v173_v21  ;;  %v176_v11 = vld [vmem:[%s5692_s25 + $0x28] sm:$0xff]  ;;  %v6203_v21 = vld [vmem:[%s5692_s25 + $0x5a] sm:$0xff] }
  0x5d   : > { %5136 = vmatprep.mubr.msk.f32.mxu0 %vm246_vm1, %v5924_v22  ;;  %4992 = vmatprep.subr.msk.mxu1 %vm355_vm0, %v5929_v23 }
  0x5f   : > { %4886 = vmatmul.mubr.msk.f32.gmra.mrb[2].mxu1 %vm246_vm1, %v174_v24  ;;  %5137 = vmatmul.mubr.msk.f32.gmra.mrb[20].mxu0 %vm246_vm1, %v5939_v25  ;;  %v6220_v24 = vld [vmem:[%s5692_s25 + $0x72] sm:$0xff] }
  0x60   : > { %4888 = vmatprep.mubr.msk.f32.mxu1 %vm246_vm1, %v175_v26  ;;  %5139 = vmatprep.mubr.msk.f32.mxu0 %vm246_vm1, %v5945_v27  ;;  %v6234_v26 = vld [vmem:[%s5692_s25 + $0x82] sm:$0xff] }
  0x63   : > { %4889 = vmatmul.mubr.msk.f32.gmra.mrb[4].mxu1 %vm246_vm1, %v176_v11  ;;  %5140 = vmatmul.mubr.msk.f32.gmra.mrb[22].mxu0 %vm246_vm1, %v5957_v28  ;;  %v6245_v11 = vld [vmem:[%s5692_s25 + $0x8a] sm:$0xff] }
  0x64   : > { %4891 = vmatprep.mubr.msk.f32.mxu1 %vm246_vm1, %v177_v29  ;;  %5142 = vmatprep.mubr.msk.f32.mxu0 %vm246_vm1, %v5961_v30  ;;  %v6249_v29 = vld [vmem:[%s5692_s25 + $0x92] sm:$0xff] }
  0x67   : > { %4892 = vmatmul.mubr.msk.f32.gmra.mrb[6].mxu1 %vm246_vm1, %v178_v31  ;;  %5143 = vmatmul.mubr.msk.f32.gmra.mrb[24].mxu0 %vm246_vm1, %v5971_v32  ;;  %v6259_v31 = vld [vmem:[%s5692_s25 + $0x9a] sm:$0xff] }
  0x68   : > { %4894 = vmatprep.mubr.msk.f32.mxu1 %vm246_vm1, %v179_v33  ;;  %5145 = vmatprep.mubr.msk.f32.mxu0 %vm246_vm1, %v5975_v34  ;;  %v6263_v33 = vld [vmem:[%s5692_s25 + $0xa2] sm:$0xff] }
  0x6b   : > { %4895 = vmatmul.mubr.msk.f32.gmra.mrb[8].mxu1 %vm246_vm1, %v180_v35  ;;  %5146 = vmatmul.mubr.msk.f32.gmra.mrb[26].mxu0 %vm246_vm1, %v5985_v36  ;;  %v6274_v35 = vld [vmem:[%s5692_s25 + $0xaa] sm:$0xff] }
  0x6c   : > { %4897 = vmatprep.mubr.msk.f32.mxu1 %vm246_vm1, %v181_v37  ;;  %5148 = vmatprep.mubr.msk.f32.mxu0 %vm246_vm1, %v5989_v38  ;;  %v6279_v37 = vld [vmem:[%s5692_s25 + $0xb2] sm:$0xff] }
  0x6f   : > { %4898 = vmatmul.mubr.msk.f32.gmra.mrb[10].mxu1 %vm246_vm1, %v182_v39  ;;  %5149 = vmatmul.mubr.msk.f32.gmra.mrb[28].mxu0 %vm246_vm1, %v5999_v40  ;;  %v6289_v39 = vld [vmem:[%s5692_s25 + $0xba] sm:$0xff] }
  0x70   : > { %4900 = vmatprep.mubr.msk.f32.mxu1 %vm246_vm1, %v183_v41  ;;  %5151 = vmatprep.mubr.msk.f32.mxu0 %vm246_vm1, %v6003_v42  ;;  %v6293_v41 = vld [vmem:[%s5692_s25 + $0xc2] sm:$0xff] }
  0x73   : > { %4901 = vmatmul.mubr.msk.f32.gmra.mrb[12].mxu1 %vm246_vm1, %v184_v43  ;;  %5152 = vmatmul.mubr.msk.f32.gmra.mrb[30].mxu0 %vm246_vm1, %v6013_v44  ;;  %v6303_v43 = vld [vmem:[%s5692_s25 + $0xca] sm:$0xff] }
  0x74   : > { %4903 = vmatprep.mubr.msk.f32.mxu1 %vm246_vm1, %v185_v45  ;;  %5154 = vmatprep.mubr.msk.f32.mxu0 %vm246_vm1, %v6017_v46  ;;  %v6307_v45 = vld [vmem:[%s5692_s25 + $0xd2] sm:$0xff] }
  0x77   : > { %4904 = vmatmul.mubr.msk.f32.gmra.mrb[14].mxu1 %vm246_vm1, %v186_v49  ;;  %5155 = vmatmul.mubr.msk.f32.gmra.mrb[32].mxu0 %vm246_vm1, %v6027_v51  ;;  %v6317_v49 = vld [vmem:[%s5692_s25 + $0xda] sm:$0xff] }
  0x78   : > { %4906 = vmatprep.mubr.msk.f32.mxu1 %vm246_vm1, %v187_v53  ;;  %5157 = vmatprep.mubr.msk.f32.mxu0 %vm246_vm1, %v6031_v55  ;;  %v6321_v53 = vld [vmem:[%s5692_s25 + $0xe2] sm:$0xff] }
  0x7b   : > { %4907 = vmatmul.mubr.msk.f32.gmra.mrb[16].mxu1 %vm246_vm1, %v188_v57  ;;  %5158 = vmatmul.mubr.msk.f32.gmra.mrb[34].mxu0 %vm246_vm1, %v6041_v59  ;;  %v6331_v57 = vld [vmem:[%s5692_s25 + $0xea] sm:$0xff] }
  0x7c   : > { %4909 = vmatprep.mubr.msk.f32.mxu1 %vm246_vm1, %v189_v61  ;;  %5162 = vmatprep.mubr.msk.f32.mxu0 %vm246_vm1, %v5790_v47  ;;  %v192_v47 = vld [vmem:[%s5692_s25 + $0xa8] sm:$0xff]  ;;  %v6335_v61 = vld [vmem:[%s5692_s25 + $0xf2] sm:$0xff] }
  0x7f   : > { %4910 = vmatmul.mubr.msk.f32.gmra.mrb[18].mxu1 %vm246_vm1, %v190_v63  ;;  %5163 = vmatmul.mubr.msk.f32.vlgmr.msra.gmra.mrb[0].mxu0 %vm246_vm1, %v5804_v50  ;;  %v195_v50 = vld [vmem:[%s5692_s25 + $0xc0] sm:$0xff] }
  0x80   : > { %5217 = vmatpush3.msk.msra.mxu0 %vm355_vm0, %v5795_v48  ;;  %4912 = vmatprep.mubr.msk.f32.mxu1 %vm246_vm1, %v191_v2  ;;  %v194_v48 = vld [vmem:[%s5692_s25 + $0xb8] sm:$0xff]  ;;  %v3122_v63 = vld [vmem:[%s5692_s25 + $0x85] sm:$0xff] }
  0x81   : > { %5165 = vmatprep.mubr.msk.f32.mxu0 %vm246_vm1, %v5810_v52  ;;  %5272 = vmatprep.subr.msk.mxu0 %vm355_vm0, %v6055_v4  ;;  %v196_v52 = vld [vmem:[%s5692_s25 + $0xc8] sm:$0xff]  ;;  %v6345_v2 = vld [vmem:[%s5692_s25 + $0xfa] sm:$0xff] }
  0x83   : > { %4913 = vmatmul.mubr.msk.f32.gmra.mrb[20].mxu1 %vm246_vm1, %v192_v47  ;;  %5166 = vmatmul.mubr.msk.f32.gmra.mrb[2].mxu0 %vm246_vm1, %v5822_v54  ;;  %v197_v54 = vld [vmem:[%s5692_s25 + $0xd0] sm:$0xff]  ;;  %v6349_v47 = vld [vmem:[%s5692_s25 + $0x102] sm:$0xff] }
  0x84   : > { %4915 = vmatprep.mubr.msk.f32.mxu1 %vm246_vm1, %v193_v6  ;;  %5168 = vmatprep.mubr.msk.f32.mxu0 %vm246_vm1, %v5826_v56  ;;  %v198_v56 = vld [vmem:[%s5692_s25 + $0xd8] sm:$0xff] }
  0x85   : > { %v3124_v6 = vld [vmem:[%s5692_s25 + $0x95] sm:$0xff] }
  0x87   : > { %4916 = vmatmul.mubr.msk.f32.gmra.mrb[22].mxu1 %vm246_vm1, %v194_v48  ;;  %5169 = vmatmul.mubr.msk.f32.gmra.mrb[4].mxu0 %vm246_vm1, %v5836_v58  ;;  %v199_v58 = vld [vmem:[%s5692_s25 + $0xe0] sm:$0xff]  ;;  %v6359_v48 = vld [vmem:[%s5692_s25 + $0x10a] sm:$0xff] }
  0x88   : > { %4918 = vmatprep.mubr.msk.f32.mxu1 %vm246_vm1, %v195_v50  ;;  %5171 = vmatprep.mubr.msk.f32.mxu0 %vm246_vm1, %v5840_v60  ;;  %v200_v60 = vld [vmem:[%s5692_s25 + $0xe8] sm:$0xff]  ;;  %v3125_v50 = vld [vmem:[%s5692_s25 + $0x9d] sm:$0xff] }
  0x8b   : > { %4919 = vmatmul.mubr.msk.f32.gmra.mrb[24].mxu1 %vm246_vm1, %v196_v52  ;;  %5172 = vmatmul.mubr.msk.f32.gmra.mrb[6].mxu0 %vm246_vm1, %v5850_v62  ;;  %v201_v62 = vld [vmem:[%s5692_s25 + $0xf0] sm:$0xff] }
  0x8c   : > { %4921 = vmatprep.mubr.msk.f32.mxu1 %vm246_vm1, %v197_v54  ;;  %5174 = vmatprep.mubr.msk.f32.mxu0 %vm246_vm1, %v5854_v0  ;;  %v202_v0 = vld [vmem:[%s5692_s25 + $0xf8] sm:$0xff]  ;;  %v3126_v54 = vld [vmem:[%s5692_s25 + $0xa5] sm:$0xff] }
  0x8d   : > { %v6363_v52 = vld [vmem:[%s5692_s25 + $0x112] sm:$0xff] }
  0x8f   : > { %4922 = vmatmul.mubr.msk.f32.gmra.mrb[26].mxu1 %vm246_vm1, %v198_v56  ;;  %5175 = vmatmul.mubr.msk.f32.gmra.mrb[8].mxu0 %vm246_vm1, %v5864_v3  ;;  %v203_v3 = vld [vmem:[%s5692_s25 + $0x100] sm:$0xff] }
  0x90   : > { %4924 = vmatprep.mubr.msk.f32.mxu1 %vm246_vm1, %v199_v58  ;;  %5177 = vmatprep.mubr.msk.f32.mxu0 %vm246_vm1, %v5868_v5  ;;  %v204_v5 = vld [vmem:[%s5692_s25 + $0x108] sm:$0xff]  ;;  %v6373_v56 = vld [vmem:[%s5692_s25 + $0x11a] sm:$0xff] }
  0x91   : > { %v3127_v58 = vld [vmem:[%s5692_s25 + $0xad] sm:$0xff] }
  0x93   : > { %4925 = vmatmul.mubr.msk.f32.gmra.mrb[28].mxu1 %vm246_vm1, %v200_v60  ;;  %5178 = vmatmul.mubr.msk.f32.gmra.mrb[10].mxu0 %vm246_vm1, %v5878_v7  ;;  %v205_v7 = vld [vmem:[%s5692_s25 + $0x110] sm:$0xff] }
  0x94   : > { %4927 = vmatprep.mubr.msk.f32.mxu1 %vm246_vm1, %v201_v62  ;;  %5180 = vmatprep.mubr.msk.f32.mxu0 %vm246_vm1, %v5882_v9  ;;  %v960_v9 = vld [vmem:[%s5692_s25 + $0x2] sm:$0xff]  ;;  %v3128_v60 = vld [vmem:[%s5692_s25 + $0xb5] sm:$0xff] }
  0x95   : > { %v3129_v62 = vld [vmem:[%s5692_s25 + $0xbd] sm:$0xff] }
  0x97   : > { %4928 = vmatmul.mubr.msk.f32.gmra.mrb[30].mxu1 %vm246_vm1, %v202_v0  ;;  %5181 = vmatmul.mubr.msk.f32.gmra.mrb[12].mxu0 %vm246_vm1, %v5892_v12  ;;  %v6133_v12 = vld [vmem:[%s5692_s25 + $0x12] sm:$0xff]  ;;  %v3130_v0 = vld [vmem:[%s5692_s25 + $0xc5] sm:$0xff] }
  0x98   : > { %4930 = vmatprep.mubr.msk.f32.mxu1 %vm246_vm1, %v203_v3  ;;  %5183 = vmatprep.mubr.msk.f32.mxu0 %vm246_vm1, %v5896_v14  ;;  %v6148_v14 = vld [vmem:[%s5692_s25 + $0x22] sm:$0xff]  ;;  %v3131_v3 = vld [vmem:[%s5692_s25 + $0xcd] sm:$0xff] }
  0x9b   : > { %4931 = vmatmul.mubr.msk.f32.gmra.mrb[32].mxu1 %vm246_vm1, %v204_v5  ;;  %5184 = vmatmul.mubr.msk.f32.gmra.mrb[14].mxu0 %vm246_vm1, %v5906_v16  ;;  %v6164_v16 = vld [vmem:[%s5692_s25 + $0x32] sm:$0xff] }
  0x9c   : > { %4933 = vmatprep.mubr.msk.f32.mxu1 %vm246_vm1, %v205_v7  ;;  %5186 = vmatprep.mubr.msk.f32.mxu0 %vm246_vm1, %v5910_v18  ;;  %v6178_v18 = vld [vmem:[%s5692_s25 + $0x42] sm:$0xff]  ;;  %v3132_v5 = vld [vmem:[%s5692_s25 + $0xd5] sm:$0xff] }
  0x9d   : > { %v3134_v7 = vld [vmem:[%s5692_s25 + $0xe5] sm:$0xff] }
  0x9f   : > { %4934 = vmatmul.mubr.msk.f32.gmra.mrb[34].mxu1 %vm246_vm1, %v206_v8  ;;  %5187 = vmatmul.mubr.msk.f32.gmra.mrb[16].mxu0 %vm246_vm1, %v5920_v20  ;;  %v6192_v20 = vld [vmem:[%s5692_s25 + $0x52] sm:$0xff] }
  0xa0   : > { %4938 = vmatprep.mubr.msk.f32.mxu1 %vm246_vm1, %v960_v9  ;;  %5189 = vmatprep.mubr.msk.f32.mxu0 %vm246_vm1, %v5924_v22  ;;  %v6206_v22 = vld [vmem:[%s5692_s25 + $0x62] sm:$0xff]  ;;  %v3135_v8 = vld [vmem:[%s5692_s25 + $0xed] sm:$0xff]  ;;  %v3136_v9 = vld [vmem:[%s5692_s25 + $0xf5] sm:$0xff] }
  0xa3   : > { %4939 = vmatmul.mubr.msk.f32.vlgmr.msra.gmra.mrb[0].mxu1 %vm246_vm1, %v961_v10  ;;  %5190 = vmatmul.mubr.msk.f32.gmra.mrb[18].mxu0 %vm246_vm1, %v5939_v25  ;;  %v6231_v25 = vld [vmem:[%s5692_s25 + $0x7a] sm:$0xff] }
  0xa4   : > { %4993 = vmatpush3.msk.msra.mxu1 %vm355_vm0, %v5929_v23  ;;  %4941 = vmatprep.mubr.msk.f32.mxu1 %vm246_vm1, %v6133_v12  ;;  %v6217_v23 = vld [vmem:[%s5692_s25 + $0x6a] sm:$0xff]  ;;  %v3137_v10 = vld [vmem:[%s5692_s25 + $0xfd] sm:$0xff] }
  0xa5   : > { %5192 = vmatprep.mubr.msk.f32.mxu0 %vm246_vm1, %v5945_v27  ;;  %5328 = vmatprep.subr.msk.mxu1 %vm355_vm0, %v5670_v1  ;;  %v2714_v27 = vld [vmem:[%s5692_s25 + $0x134] sm:$0xff] }
  0xa7   : > { %4942 = vmatmul.mubr.msk.f32.gmra.mrb[2].mxu1 %vm246_vm1, %v6143_v13  ;;  %5193 = vmatmul.mubr.msk.f32.gmra.mrb[20].mxu0 %vm246_vm1, %v5957_v28  ;;  %v2715_v28 = vld [vmem:[%s5692_s25 + $0x13c] sm:$0xff] }
  0xa8   : > { %4944 = vmatprep.mubr.msk.f32.mxu1 %vm246_vm1, %v6148_v14  ;;  %5195 = vmatprep.mubr.msk.f32.mxu0 %vm246_vm1, %v5961_v30  ;;  %v3110_v30 = vld [vmem:[%s5692_s25 + $0x25] sm:$0xff] }
  0xab   : > { %4945 = vmatmul.mubr.msk.f32.gmra.mrb[4].mxu1 %vm246_vm1, %v6161_v15  ;;  %5196 = vmatmul.mubr.msk.f32.gmra.mrb[22].mxu0 %vm246_vm1, %v5971_v32  ;;  %v3111_v32 = vld [vmem:[%s5692_s25 + $0x2d] sm:$0xff] }
  0xac   : > { %4947 = vmatprep.mubr.msk.f32.mxu1 %vm246_vm1, %v6164_v16  ;;  %5198 = vmatprep.mubr.msk.f32.mxu0 %vm246_vm1, %v5975_v34  ;;  %v3112_v34 = vld [vmem:[%s5692_s25 + $0x35] sm:$0xff] }
  0xaf   : > { %4948 = vmatmul.mubr.msk.f32.gmra.mrb[6].mxu1 %vm246_vm1, %v6175_v17  ;;  %5199 = vmatmul.mubr.msk.f32.gmra.mrb[24].mxu0 %vm246_vm1, %v5985_v36  ;;  %v3113_v36 = vld [vmem:[%s5692_s25 + $0x3d] sm:$0xff] }
  0xb0   : > { %4950 = vmatprep.mubr.msk.f32.mxu1 %vm246_vm1, %v6178_v18  ;;  %5201 = vmatprep.mubr.msk.f32.mxu0 %vm246_vm1, %v5989_v38  ;;  %v3114_v38 = vld [vmem:[%s5692_s25 + $0x45] sm:$0xff] }
  0xb3   : > { %4951 = vmatmul.mubr.msk.f32.gmra.mrb[8].mxu1 %vm246_vm1, %v6189_v19  ;;  %5202 = vmatmul.mubr.msk.f32.gmra.mrb[26].mxu0 %vm246_vm1, %v5999_v40  ;;  %v3115_v40 = vld [vmem:[%s5692_s25 + $0x4d] sm:$0xff] }
  0xb4   : > { %4953 = vmatprep.mubr.msk.f32.mxu1 %vm246_vm1, %v6192_v20  ;;  %5204 = vmatprep.mubr.msk.f32.mxu0 %vm246_vm1, %v6003_v42  ;;  %v3116_v42 = vld [vmem:[%s5692_s25 + $0x55] sm:$0xff] }
  0xb7   : > { %4954 = vmatmul.mubr.msk.f32.gmra.mrb[10].mxu1 %vm246_vm1, %v6203_v21  ;;  %5205 = vmatmul.mubr.msk.f32.gmra.mrb[28].mxu0 %vm246_vm1, %v6013_v44  ;;  %v3117_v44 = vld [vmem:[%s5692_s25 + $0x5d] sm:$0xff] }
  0xb8   : > { %4956 = vmatprep.mubr.msk.f32.mxu1 %vm246_vm1, %v6206_v22  ;;  %5207 = vmatprep.mubr.msk.f32.mxu0 %vm246_vm1, %v6017_v46  ;;  %v3118_v46 = vld [vmem:[%s5692_s25 + $0x65] sm:$0xff] }
  0xbb   : > { %4957 = vmatmul.mubr.msk.f32.gmra.mrb[12].mxu1 %vm246_vm1, %v6217_v23  ;;  %5208 = vmatmul.mubr.msk.f32.gmra.mrb[30].mxu0 %vm246_vm1, %v6027_v51  ;;  %v3119_v51 = vld [vmem:[%s5692_s25 + $0x6d] sm:$0xff] }
  0xbc   : > { %4959 = vmatprep.mubr.msk.f32.mxu1 %vm246_vm1, %v6220_v24  ;;  %5210 = vmatprep.mubr.msk.f32.mxu0 %vm246_vm1, %v6031_v55  ;;  %v3120_v55 = vld [vmem:[%s5692_s25 + $0x75] sm:$0xff] }
  0xbf   : > { %4960 = vmatmul.mubr.msk.f32.gmra.mrb[14].mxu1 %vm246_vm1, %v6231_v25  ;;  %5211 = vmatmul.mubr.msk.f32.gmra.mrb[32].mxu0 %vm246_vm1, %v6041_v59  ;;  %v3121_v59 = vld [vmem:[%s5692_s25 + $0x7d] sm:$0xff] }
  0xc0   : > { %4962 = vmatprep.mubr.msk.f32.mxu1 %vm246_vm1, %v6234_v26  ;;  %5213 = vmatprep.mubr.msk.f32.mxu0 %vm246_vm1, %v2714_v27  ;;  %v3547_v27 = vld [vmem:[%s5692_s25 + $0x5e] sm:$0xff] }
  0xc3   : > { %4963 = vmatmul.mubr.msk.f32.gmra.mrb[16].mxu1 %vm246_vm1, %v6245_v11  ;;  %5214 = vmatmul.mubr.msk.f32.gmra.mrb[34].mxu0 %vm246_vm1, %v2715_v28  ;;  %v3549_v28 = vld [vmem:[%s5692_s25 + $0x6e] sm:$0xff] }
  0xc4   : > { %4965 = vmatprep.mubr.msk.f32.mxu1 %vm246_vm1, %v6249_v29  ;;  %5218 = vmatprep.mubr.msk.f32.mxu0 %vm246_vm1, %v3110_v30  ;;  %v3551_v30 = vld [vmem:[%s5692_s25 + $0x7e] sm:$0xff] }
  0xc7   : > { %4966 = vmatmul.mubr.msk.f32.gmra.mrb[18].mxu1 %vm246_vm1, %v6259_v31  ;;  %5219 = vmatmul.mubr.msk.f32.vlgmr.msra.gmra.mrb[0].mxu0 %vm246_vm1, %v3111_v32  ;;  %v3553_v32 = vld [vmem:[%s5692_s25 + $0x8e] sm:$0xff] }
  0xc8   : > { %5273 = vmatpush3.msk.msra.mxu0 %vm355_vm0, %v6055_v4  ;;  %4968 = vmatprep.mubr.msk.f32.mxu1 %vm246_vm1, %v6263_v33  ;;  %v3123_v4 = vld [vmem:[%s5692_s25 + $0x8d] sm:$0xff] }
  0xc9   : > { %5221 = vmatprep.mubr.msk.f32.mxu0 %vm246_vm1, %v3112_v34  ;;  %v3555_v34 = vld [vmem:[%s5692_s25 + $0x9e] sm:$0xff] }
  0xcb   : > { %4969 = vmatmul.mubr.msk.f32.gmra.mrb[20].mxu1 %vm246_vm1, %v6274_v35  ;;  %5222 = vmatmul.mubr.msk.f32.gmra.mrb[2].mxu0 %vm246_vm1, %v3113_v36  ;;  %v3556_v36 = vld [vmem:[%s5692_s25 + $0xa6] sm:$0xff] }
  0xcc   : > { %4971 = vmatprep.mubr.msk.f32.mxu1 %vm246_vm1, %v6279_v37  ;;  %5224 = vmatprep.mubr.msk.f32.mxu0 %vm246_vm1, %v3114_v38  ;;  %v3557_v38 = vld [vmem:[%s5692_s25 + $0xae] sm:$0xff] }
  0xcf   : > { %4972 = vmatmul.mubr.msk.f32.gmra.mrb[22].mxu1 %vm246_vm1, %v6289_v39  ;;  %5225 = vmatmul.mubr.msk.f32.gmra.mrb[4].mxu0 %vm246_vm1, %v3115_v40  ;;  %v3558_v40 = vld [vmem:[%s5692_s25 + $0xb6] sm:$0xff] }
  0xd0   : > { %4974 = vmatprep.mubr.msk.f32.mxu1 %vm246_vm1, %v6293_v41  ;;  %5227 = vmatprep.mubr.msk.f32.mxu0 %vm246_vm1, %v3116_v42  ;;  %v3559_v42 = vld [vmem:[%s5692_s25 + $0xbe] sm:$0xff] }
  0xd3   : > { %4975 = vmatmul.mubr.msk.f32.gmra.mrb[24].mxu1 %vm246_vm1, %v6303_v43  ;;  %5228 = vmatmul.mubr.msk.f32.gmra.mrb[6].mxu0 %vm246_vm1, %v3117_v44  ;;  %v3560_v44 = vld [vmem:[%s5692_s25 + $0xc6] sm:$0xff] }
  0xd4   : > { %4977 = vmatprep.mubr.msk.f32.mxu1 %vm246_vm1, %v6307_v45  ;;  %5230 = vmatprep.mubr.msk.f32.mxu0 %vm246_vm1, %v3118_v46  ;;  %v3561_v46 = vld [vmem:[%s5692_s25 + $0xce] sm:$0xff] }
  0xd7   : > { %4978 = vmatmul.mubr.msk.f32.gmra.mrb[26].mxu1 %vm246_vm1, %v6317_v49  ;;  %5231 = vmatmul.mubr.msk.f32.gmra.mrb[8].mxu0 %vm246_vm1, %v3119_v51  ;;  %v3562_v51 = vld [vmem:[%s5692_s25 + $0xd6] sm:$0xff] }
  0xd8   : > { %4980 = vmatprep.mubr.msk.f32.mxu1 %vm246_vm1, %v6321_v53  ;;  %5233 = vmatprep.mubr.msk.f32.mxu0 %vm246_vm1, %v3120_v55  ;;  %v3563_v55 = vld [vmem:[%s5692_s25 + $0xde] sm:$0xff] }
  0xdb   : > { %4981 = vmatmul.mubr.msk.f32.gmra.mrb[28].mxu1 %vm246_vm1, %v6331_v57  ;;  %5234 = vmatmul.mubr.msk.f32.gmra.mrb[10].mxu0 %vm246_vm1, %v3121_v59  ;;  %v3564_v59 = vld [vmem:[%s5692_s25 + $0xe6] sm:$0xff] }
  0xdc   : > { %4983 = vmatprep.mubr.msk.f32.mxu1 %vm246_vm1, %v6335_v61  ;;  %5236 = vmatprep.mubr.msk.f32.mxu0 %vm246_vm1, %v3122_v63  ;;  %v3565_v63 = vld [vmem:[%s5692_s25 + $0xee] sm:$0xff] }
  0xdf   : > { %4984 = vmatmul.mubr.msk.f32.gmra.mrb[30].mxu1 %vm246_vm1, %v6345_v2  ;;  %5237 = vmatmul.mubr.msk.f32.gmra.mrb[12].mxu0 %vm246_vm1, %v3123_v4  ;;  %v3566_v4 = vld [vmem:[%s5692_s25 + $0xf6] sm:$0xff] }
  0xe0   : > { %4986 = vmatprep.mubr.msk.f32.mxu1 %vm246_vm1, %v6349_v47  ;;  %5239 = vmatprep.mubr.msk.f32.mxu0 %vm246_vm1, %v3124_v6  ;;  %v3567_v6 = vld [vmem:[%s5692_s25 + $0xfe] sm:$0xff] }
  0xe3   : > { %4987 = vmatmul.mubr.msk.f32.gmra.mrb[32].mxu1 %vm246_vm1, %v6359_v48  ;;  %5240 = vmatmul.mubr.msk.f32.gmra.mrb[14].mxu0 %vm246_vm1, %v3125_v50  ;;  %v3568_v50 = vld [vmem:[%s5692_s25 + $0x106] sm:$0xff] }
  0xe4   : > { %4989 = vmatprep.mubr.msk.f32.mxu1 %vm246_vm1, %v6363_v52  ;;  %5242 = vmatprep.mubr.msk.f32.mxu0 %vm246_vm1, %v3126_v54  ;;  %v3569_v54 = vld [vmem:[%s5692_s25 + $0x10e] sm:$0xff] }
  0xe7   : > { %4990 = vmatmul.mubr.msk.f32.gmra.mrb[34].mxu1 %vm246_vm1, %v6373_v56  ;;  %5243 = vmatmul.mubr.msk.f32.gmra.mrb[16].mxu0 %vm246_vm1, %v3127_v58  ;;  %v3570_v58 = vld [vmem:[%s5692_s25 + $0x116] sm:$0xff] }
  0xe8   : > { %4994 = vmatprep.mubr.msk.f32.mxu1 %vm246_vm1, %v6133_v12  ;;  %5245 = vmatprep.mubr.msk.f32.mxu0 %vm246_vm1, %v3128_v60  ;;  %v3138_v12 = vld [vmem:[%s5692_s25 + $0x105] sm:$0xff] }
  0xe9   : > { %v1851_v60 = vld [vmem:[%s5692_s25 + $0x10b] sm:$0xff] }
  0xeb   : > { %4995 = vmatmul.mubr.msk.f32.vlgmr.msra.gmra.mrb[0].mxu1 %vm246_vm1, %v6143_v13  ;;  %5246 = vmatmul.mubr.msk.f32.gmra.mrb[18].mxu0 %vm246_vm1, %v3129_v62  ;;  %v3139_v13 = vld [vmem:[%s5692_s25 + $0x10d] sm:$0xff]  ;;  %v3571_v62 = vld [vmem:[%s5692_s25 + $0x11e] sm:$0xff] }
  0xec   : > { %5329 = vmatpush3.msk.msra.mxu1 %vm355_vm0, %v5670_v1  ;;  %4997 = vmatprep.mubr.msk.f32.mxu1 %vm246_vm1, %v6148_v14  ;;  %v3133_v1 = vld [vmem:[%s5692_s25 + $0xdd] sm:$0xff]  ;;  %v3140_v14 = vld [vmem:[%s5692_s25 + $0x115] sm:$0xff] }
  0xed   : > { %5248 = vmatprep.mubr.msk.f32.mxu0 %vm246_vm1, %v3130_v0  ;;  %v1852_v0 = vld [vmem:[%s5692_s25 + $0x113] sm:$0xff] }
  0xef   : > { %4998 = vmatmul.mubr.msk.f32.gmra.mrb[2].mxu1 %vm246_vm1, %v6161_v15  ;;  %5249 = vmatmul.mubr.msk.f32.gmra.mrb[20].mxu0 %vm246_vm1, %v3131_v3  ;;  %v3141_v15 = vld [vmem:[%s5692_s25 + $0x11d] sm:$0xff]  ;;  %v3572_v3 = vld [vmem:[%s5692_s25 + $0x126] sm:$0xff] }
  0xf0   : > { %5000 = vmatprep.mubr.msk.f32.mxu1 %vm246_vm1, %v6164_v16  ;;  %5251 = vmatprep.mubr.msk.f32.mxu0 %vm246_vm1, %v3132_v5  ;;  %v3142_v16 = vld [vmem:[%s5692_s25 + $0x125] sm:$0xff]  ;;  %v1853_v5 = vld [vmem:[%s5692_s25 + $0x11b] sm:$0xff] }
  0xf3   : > { %5001 = vmatmul.mubr.msk.f32.gmra.mrb[4].mxu1 %vm246_vm1, %v6175_v17  ;;  %5252 = vmatmul.mubr.msk.f32.gmra.mrb[22].mxu0 %vm246_vm1, %v3133_v1  ;;  %v3143_v17 = vld [vmem:[%s5692_s25 + $0x12d] sm:$0xff] }
  0xf4   : > { %5003 = vmatprep.mubr.msk.f32.mxu1 %vm246_vm1, %v6178_v18  ;;  %5254 = vmatprep.mubr.msk.f32.mxu0 %vm246_vm1, %v3134_v7  ;;  %v3144_v18 = vld [vmem:[%s5692_s25 + $0x135] sm:$0xff]  ;;  %v1854_v7 = vld [vmem:[%s5692_s25 + $0x123] sm:$0xff] }
  0xf5   : > { %v3573_v1 = vld [vmem:[%s5692_s25 + $0x12e] sm:$0xff] }
  0xf7   : > { %5004 = vmatmul.mubr.msk.f32.gmra.mrb[6].mxu1 %vm246_vm1, %v6189_v19  ;;  %5255 = vmatmul.mubr.msk.f32.gmra.mrb[24].mxu0 %vm246_vm1, %v3135_v8  ;;  %v3145_v19 = vld [vmem:[%s5692_s25 + $0x13d] sm:$0xff] }
  0xf8   : > { %5006 = vmatprep.mubr.msk.f32.mxu1 %vm246_vm1, %v6192_v20  ;;  %5257 = vmatprep.mubr.msk.f32.mxu0 %vm246_vm1, %v3136_v9  ;;  %v3540_v20 = vld [vmem:[%s5692_s25 + $0x26] sm:$0xff]  ;;  %v3574_v8 = vld [vmem:[%s5692_s25 + $0x136] sm:$0xff] }
  0xf9   : > { %v1855_v9 = vld [vmem:[%s5692_s25 + $0x12b] sm:$0xff] }
  0xfb   : > { %5007 = vmatmul.mubr.msk.f32.gmra.mrb[8].mxu1 %vm246_vm1, %v6203_v21  ;;  %5258 = vmatmul.mubr.msk.f32.gmra.mrb[26].mxu0 %vm246_vm1, %v3137_v10  ;;  %v3541_v21 = vld [vmem:[%s5692_s25 + $0x2e] sm:$0xff]  ;;  %v3575_v10 = vld [vmem:[%s5692_s25 + $0x13e] sm:$0xff] }
  0xfc   : > { %5009 = vmatprep.mubr.msk.f32.mxu1 %vm246_vm1, %v6206_v22  ;;  %5260 = vmatprep.mubr.msk.f32.mxu0 %vm246_vm1, %v3138_v12  ;;  %v3542_v22 = vld [vmem:[%s5692_s25 + $0x36] sm:$0xff] }
  0xff   : > { %5010 = vmatmul.mubr.msk.f32.gmra.mrb[10].mxu1 %vm246_vm1, %v6217_v23  ;;  %5261 = vmatmul.mubr.msk.f32.gmra.mrb[28].mxu0 %vm246_vm1, %v3139_v13  ;;  %v3543_v23 = vld [vmem:[%s5692_s25 + $0x3e] sm:$0xff] }
 0x100   : > { %5012 = vmatprep.mubr.msk.f32.mxu1 %vm246_vm1, %v6220_v24  ;;  %5263 = vmatprep.mubr.msk.f32.mxu0 %vm246_vm1, %v3140_v14  ;;  %v3544_v24 = vld [vmem:[%s5692_s25 + $0x46] sm:$0xff] }
 0x103   : > { %5013 = vmatmul.mubr.msk.f32.gmra.mrb[12].mxu1 %vm246_vm1, %v6231_v25  ;;  %5264 = vmatmul.mubr.msk.f32.gmra.mrb[30].mxu0 %vm246_vm1, %v3141_v15  ;;  %v3545_v25 = vld [vmem:[%s5692_s25 + $0x4e] sm:$0xff] }
 0x104   : > { %5015 = vmatprep.mubr.msk.f32.mxu1 %vm246_vm1, %v6234_v26  ;;  %5266 = vmatprep.mubr.msk.f32.mxu0 %vm246_vm1, %v3142_v16  ;;  %v3546_v26 = vld [vmem:[%s5692_s25 + $0x56] sm:$0xff] }
 0x107   : > { %5016 = vmatmul.mubr.msk.f32.gmra.mrb[14].mxu1 %vm246_vm1, %v6245_v11  ;;  %5267 = vmatmul.mubr.msk.f32.gmra.mrb[32].mxu0 %vm246_vm1, %v3143_v17  ;;  %v3548_v11 = vld [vmem:[%s5692_s25 + $0x66] sm:$0xff] }
 0x108   : > { %5018 = vmatprep.mubr.msk.f32.mxu1 %vm246_vm1, %v6249_v29  ;;  %5269 = vmatprep.mubr.msk.f32.mxu0 %vm246_vm1, %v3144_v18  ;;  %v3550_v29 = vld [vmem:[%s5692_s25 + $0x76] sm:$0xff] }
 0x10b   : > { %5019 = vmatmul.mubr.msk.f32.gmra.mrb[16].mxu1 %vm246_vm1, %v6259_v31  ;;  %5270 = vmatmul.mubr.msk.f32.gmra.mrb[34].mxu0 %vm246_vm1, %v3145_v19  ;;  %v3552_v31 = vld [vmem:[%s5692_s25 + $0x86] sm:$0xff] }
 0x10c   : > { %5021 = vmatprep.mubr.msk.f32.mxu1 %vm246_vm1, %v6263_v33  ;;  %5274 = vmatprep.mubr.msk.f32.mxu0 %vm246_vm1, %v3540_v20  ;;  %v3554_v33 = vld [vmem:[%s5692_s25 + $0x96] sm:$0xff] }
 0x10f   : > { %5022 = vmatmul.mubr.msk.f32.gmra.mrb[18].mxu1 %vm246_vm1, %v6274_v35  ;;  %5275 = vmatmul.mubr.msk.f32.vlgmr.msra.gmra.mrb[0].mxu0 %vm246_vm1, %v3541_v21  ;;  %v1424_v35 = vld [vmem:[%s5692_s25 + $0x122] sm:$0xff] }
 0x110   : > { %5024 = vmatprep.mubr.msk.f32.mxu1 %vm246_vm1, %v6279_v37  ;;  %5277 = vmatprep.mubr.msk.f32.mxu0 %vm246_vm1, %v3542_v22  ;;  %v1425_v37 = vld [vmem:[%s5692_s25 + $0x12a] sm:$0xff] }
 0x113   : > { %5025 = vmatmul.mubr.msk.f32.gmra.mrb[20].mxu1 %vm246_vm1, %v6289_v39  ;;  %5278 = vmatmul.mubr.msk.f32.gmra.mrb[2].mxu0 %vm246_vm1, %v3543_v23  ;;  %v1838_v39 = vld [vmem:[%s5692_s25 + $0xa3] sm:$0xff] }
 0x114   : > { %5027 = vmatprep.mubr.msk.f32.mxu1 %vm246_vm1, %v6293_v41  ;;  %5280 = vmatprep.mubr.msk.f32.mxu0 %vm246_vm1, %v3544_v24  ;;  %v1839_v41 = vld [vmem:[%s5692_s25 + $0xab] sm:$0xff] }
 0x117   : > { %5028 = vmatmul.mubr.msk.f32.gmra.mrb[22].mxu1 %vm246_vm1, %v6303_v43  ;;  %5281 = vmatmul.mubr.msk.f32.gmra.mrb[4].mxu0 %vm246_vm1, %v3545_v25  ;;  %v1840_v43 = vld [vmem:[%s5692_s25 + $0xb3] sm:$0xff] }
 0x118   : > { %5030 = vmatprep.mubr.msk.f32.mxu1 %vm246_vm1, %v6307_v45  ;;  %5283 = vmatprep.mubr.msk.f32.mxu0 %vm246_vm1, %v3546_v26  ;;  %v1841_v45 = vld [vmem:[%s5692_s25 + $0xbb] sm:$0xff] }
 0x11b   : > { %5031 = vmatmul.mubr.msk.f32.gmra.mrb[24].mxu1 %vm246_vm1, %v6317_v49  ;;  %5284 = vmatmul.mubr.msk.f32.gmra.mrb[6].mxu0 %vm246_vm1, %v3547_v27  ;;  %v1842_v49 = vld [vmem:[%s5692_s25 + $0xc3] sm:$0xff] }
 0x11c   : > { %5033 = vmatprep.mubr.msk.f32.mxu1 %vm246_vm1, %v6321_v53  ;;  %5286 = vmatprep.mubr.msk.f32.mxu0 %vm246_vm1, %v3548_v11  ;;  %v1843_v53 = vld [vmem:[%s5692_s25 + $0xcb] sm:$0xff] }
 0x11f   : > { %5034 = vmatmul.mubr.msk.f32.gmra.mrb[26].mxu1 %vm246_vm1, %v6331_v57  ;;  %5287 = vmatmul.mubr.msk.f32.gmra.mrb[8].mxu0 %vm246_vm1, %v3549_v28  ;;  %v1844_v57 = vld [vmem:[%s5692_s25 + $0xd3] sm:$0xff] }
 0x120   : > { %5036 = vmatprep.mubr.msk.f32.mxu1 %vm246_vm1, %v6335_v61  ;;  %5289 = vmatprep.mubr.msk.f32.mxu0 %vm246_vm1, %v3550_v29  ;;  %v1845_v61 = vld [vmem:[%s5692_s25 + $0xdb] sm:$0xff] }
 0x123   : > { %5037 = vmatmul.mubr.msk.f32.gmra.mrb[28].mxu1 %vm246_vm1, %v6345_v2  ;;  %5290 = vmatmul.mubr.msk.f32.gmra.mrb[10].mxu0 %vm246_vm1, %v3551_v30  ;;  %v1846_v2 = vld [vmem:[%s5692_s25 + $0xe3] sm:$0xff]  ;;  %v6613_v30 = vld [vmem:[%s6703_s2] ss:$0 sm:$0xff] }
 0x124   : > { %5039 = vmatprep.mubr.msk.f32.mxu1 %vm246_vm1, %v6349_v47  ;;  %5292 = vmatprep.mubr.msk.f32.mxu0 %vm246_vm1, %v3552_v31  ;;  %v1847_v47 = vld [vmem:[%s5692_s25 + $0xeb] sm:$0xff] }
 0x127   : > { %5040 = vmatmul.mubr.msk.f32.gmra.mrb[30].mxu1 %vm246_vm1, %v6359_v48  ;;  %5293 = vmatmul.mubr.msk.f32.gmra.mrb[12].mxu0 %vm246_vm1, %v3553_v32  ;;  %v1848_v48 = vld [vmem:[%s5692_s25 + $0xf3] sm:$0xff] }
 0x128   : > { %5042 = vmatprep.mubr.msk.f32.mxu1 %vm246_vm1, %v6363_v52  ;;  %5295 = vmatprep.mubr.msk.f32.mxu0 %vm246_vm1, %v3554_v33  ;;  %v1849_v52 = vld [vmem:[%s5692_s25 + $0xfb] sm:$0xff] }
 0x12b   : > { %5043 = vmatmul.mubr.msk.f32.gmra.mrb[32].mxu1 %vm246_vm1, %v6373_v56  ;;  %5296 = vmatmul.mubr.msk.f32.gmra.mrb[14].mxu0 %vm246_vm1, %v3555_v34  ;;  %v1850_v56 = vld [vmem:[%s5692_s25 + $0x103] sm:$0xff] }
 0x12c   : > { %5045 = vmatprep.mubr.msk.f32.mxu1 %vm246_vm1, %v1424_v35  ;;  %5298 = vmatprep.mubr.msk.f32.mxu0 %vm246_vm1, %v3556_v36 }
 0x12f   : > { %5046 = vmatmul.mubr.msk.f32.gmra.mrb[34].mxu1 %vm246_vm1, %v1425_v37  ;;  %5299 = vmatmul.mubr.msk.f32.gmra.mrb[16].mxu0 %vm246_vm1, %v3557_v38 }
 0x130   : > { %5077 = vmatprep.mubr.msk.f32.mxu1 %vm246_vm1, %v1838_v39  ;;  %5301 = vmatprep.mubr.msk.f32.mxu0 %vm246_vm1, %v3558_v40 }
 0x133   : > { %5078 = vmatmul.mubr.msk.f32.vlgmr.msra.gmra.mrb[18].mxu1 %vm246_vm1, %v1839_v41  ;;  %5302 = vmatmul.mubr.msk.f32.gmra.mrb[18].mxu0 %vm246_vm1, %v3559_v42 }
 0x134   : > { %5080 = vmatprep.mubr.msk.f32.mxu1 %vm246_vm1, %v1840_v43  ;;  %5304 = vmatprep.mubr.msk.f32.mxu0 %vm246_vm1, %v3560_v44 }
 0x137   : > { %5081 = vmatmul.mubr.msk.f32.gmra.mrb[20].mxu1 %vm246_vm1, %v1841_v45  ;;  %5305 = vmatmul.mubr.msk.f32.gmra.mrb[20].mxu0 %vm246_vm1, %v3561_v46 }
 0x138   : > { %5083 = vmatprep.mubr.msk.f32.mxu1 %vm246_vm1, %v1842_v49  ;;  %5307 = vmatprep.mubr.msk.f32.mxu0 %vm246_vm1, %v3562_v51 }
 0x13b   : > { %5084 = vmatmul.mubr.msk.f32.gmra.mrb[22].mxu1 %vm246_vm1, %v1843_v53  ;;  %5308 = vmatmul.mubr.msk.f32.gmra.mrb[22].mxu0 %vm246_vm1, %v3563_v55 }
 0x13c   : > { %5086 = vmatprep.mubr.msk.f32.mxu1 %vm246_vm1, %v1844_v57  ;;  %5310 = vmatprep.mubr.msk.f32.mxu0 %vm246_vm1, %v3564_v59 }
 0x13f   : > { %5087 = vmatmul.mubr.msk.f32.gmra.mrb[24].mxu1 %vm246_vm1, %v1845_v61  ;;  %5311 = vmatmul.mubr.msk.f32.gmra.mrb[24].mxu0 %vm246_vm1, %v3565_v63 }
 0x140   : > { %5089 = vmatprep.mubr.msk.f32.mxu1 %vm246_vm1, %v1846_v2  ;;  %5313 = vmatprep.mubr.msk.f32.mxu0 %vm246_vm1, %v3566_v4 }
 0x143   : > { %5090 = vmatmul.mubr.msk.f32.gmra.mrb[26].mxu1 %vm246_vm1, %v1847_v47  ;;  %5314 = vmatmul.mubr.msk.f32.gmra.mrb[26].mxu0 %vm246_vm1, %v3567_v6 }
 0x144   : > { %5092 = vmatprep.mubr.msk.f32.mxu1 %vm246_vm1, %v1848_v48  ;;  %5316 = vmatprep.mubr.msk.f32.mxu0 %vm246_vm1, %v3568_v50 }
 0x147   : > { %5093 = vmatmul.mubr.msk.f32.gmra.mrb[28].mxu1 %vm246_vm1, %v1849_v52  ;;  %5317 = vmatmul.mubr.msk.f32.gmra.mrb[28].mxu0 %vm246_vm1, %v3569_v54 }
 0x148   : > { %5095 = vmatprep.mubr.msk.f32.mxu1 %vm246_vm1, %v1850_v56  ;;  %5319 = vmatprep.mubr.msk.f32.mxu0 %vm246_vm1, %v3570_v58 }
 0x14b   : > { %5096 = vmatmul.mubr.msk.f32.gmra.mrb[30].mxu1 %vm246_vm1, %v1851_v60  ;;  %5320 = vmatmul.mubr.msk.f32.gmra.mrb[30].mxu0 %vm246_vm1, %v3571_v62 }
 0x14c   : > { %5098 = vmatprep.mubr.msk.f32.mxu1 %vm246_vm1, %v1852_v0  ;;  %5322 = vmatprep.mubr.msk.f32.mxu0 %vm246_vm1, %v3572_v3 }
 0x14f   : > { %5099 = vmatmul.mubr.msk.f32.gmra.mrb[32].mxu1 %vm246_vm1, %v1853_v5  ;;  %5323 = vmatmul.mubr.msk.f32.gmra.mrb[32].mxu0 %vm246_vm1, %v3573_v1 }
 0x150   : > { %5101 = vmatprep.mubr.msk.f32.mxu1 %vm246_vm1, %v1854_v7  ;;  %5325 = vmatprep.mubr.msk.f32.mxu0 %vm246_vm1, %v3574_v8 }
 0x153   : > { %5102 = vmatmul.mubr.msk.f32.gmra.mrb[34].mxu1 %vm246_vm1, %v1855_v9  ;;  %5326 = vmatmul.mubr.msk.f32.gmra.mrb[34].mxu0 %vm246_vm1, %v3575_v10 }
 0x1be   : > { %v4996_v12 = vpop.f32.mrb[0].mxu1 }
 0x1bf   : > { %v1605_v13 = vpop.f32.mrb[1].mxu1 }
 0x1c2   : > { %v4999_v14 = vpop.f32.mrb[2].mxu1 }
 0x1c3   : > { %v1615_v15 = vpop.f32.mrb[3].mxu1 }
 0x1c6   : > { %v5002_v16 = vpop.f32.mrb[4].mxu1 }
 0x1c7   : > { %v1625_v17 = vpop.f32.mrb[5].mxu1 }
 0x1ca   : > { %v5005_v18 = vpop.f32.mrb[6].mxu1 }
 0x1cb   : > { %v1635_v19 = vpop.f32.mrb[7].mxu1 }
 0x1ce   : > { %v5008_v20 = vpop.f32.mrb[8].mxu1 }
 0x1cf   : > { %v1645_v21 = vpop.f32.mrb[9].mxu1 }
 0x1d2   : > { %v5011_v22 = vpop.f32.mrb[10].mxu1 }
 0x1d3   : > { %v1655_v23 = vpop.f32.mrb[11].mxu1 }
 0x1d6   : > { %v6597_v24 = vpop.f32.mrb[12].mxu1 }
 0x1d7   : > { %v6599_v25 = vpop.f32.mrb[13].mxu1 }
 0x1da   : > { %v6601_v26 = vpop.f32.mrb[14].mxu1 }
 0x1db   : > { %v6603_v27 = vpop.f32.mrb[15].mxu1 }
 0x1de   : > { %v6605_v11 = vpop.f32.mrb[16].mxu1 }
 0x1df   : > { %v6607_v28 = vpop.f32.mrb[17].mxu1 }
 0x1e2   : > { %v5276_v29 = vpop.f32.mrb[0].mxu0 }
 0x1e3   : > { %v5330_v31 = vadd.f32 %v5276_v29, %v4996_v12  ;;  %v3755_v32 = vpop.f32.mrb[1].mxu0 }
 0x1e4   : > { %v5331_v33 = vadd.f32 %v3755_v32, %v1605_v13 }
 0x1e5   : > { %v3978_v34 = vadd.f32 %v5330_v31, %v6613_v30 }
 0x1e6   : > { %v3977_v35 = vadd.f32 %v5331_v33, %v6613_v30  ;;  %v5279_v36 = vpop.f32.mrb[2].mxu0 }
 0x1e7   : > { %v4014_v37 = vmax.f32 %v3978_v34, 0.0  ;;  %v5332_v38 = vadd.f32 %v5279_v36, %v4999_v14  ;;  %v3765_v39 = vpop.f32.mrb[3].mxu0 }
 0x1e8   : > { %v4013_v40 = vmax.f32 %v3977_v35, 0.0  ;;  %v5333_v41 = vadd.f32 %v3765_v39, %v1615_v15 }
 0x1e9   : > { %4050 = vst [vmem:[%s6619_s16 + $0x8] sm:$0xff] %v4014_v37  ;;  %v3980_v42 = vadd.f32 %v5332_v38, %v6613_v30 }
 0x1ea   : > { %4049 = vst [vmem:[%s6619_s16] sm:$0xff] %v4013_v40  ;;  %v3979_v43 = vadd.f32 %v5333_v41, %v6613_v30  ;;  %v5282_v44 = vpop.f32.mrb[4].mxu0 }
 0x1eb   : > { %v4016_v45 = vmax.f32 %v3980_v42, 0.0  ;;  %v5334_v46 = vadd.f32 %v5282_v44, %v5002_v16  ;;  %v3775_v49 = vpop.f32.mrb[5].mxu0 }
 0x1ec   : > { %v4015_v51 = vmax.f32 %v3979_v43, 0.0  ;;  %v5335_v53 = vadd.f32 %v3775_v49, %v1625_v17 }
 0x1ed   : > { %4052 = vst [vmem:[%s6619_s16 + $0x18] sm:$0xff] %v4016_v45  ;;  %v3982_v55 = vadd.f32 %v5334_v46, %v6613_v30 }
 0x1ee   : > { %4051 = vst [vmem:[%s6619_s16 + $0x10] sm:$0xff] %v4015_v51  ;;  %v3981_v57 = vadd.f32 %v5335_v53, %v6613_v30  ;;  %v5285_v59 = vpop.f32.mrb[6].mxu0 }
 0x1ef   : > { %v4018_v61 = vmax.f32 %v3982_v55, 0.0  ;;  %v5336_v63 = vadd.f32 %v5285_v59, %v5005_v18  ;;  %v3785_v2 = vpop.f32.mrb[7].mxu0 }
 0x1f0   : > { %v4017_v4 = vmax.f32 %v3981_v57, 0.0  ;;  %v5337_v47 = vadd.f32 %v3785_v2, %v1635_v19 }
 0x1f1   : > { %4054 = vst [vmem:[%s6619_s16 + $0x28] sm:$0xff] %v4018_v61  ;;  %v3984_v6 = vadd.f32 %v5336_v63, %v6613_v30 }
 0x1f2   : > { %4053 = vst [vmem:[%s6619_s16 + $0x20] sm:$0xff] %v4017_v4  ;;  %v3983_v48 = vadd.f32 %v5337_v47, %v6613_v30  ;;  %v5288_v50 = vpop.f32.mrb[8].mxu0 }
 0x1f3   : > { %v4020_v52 = vmax.f32 %v3984_v6, 0.0  ;;  %v5338_v54 = vadd.f32 %v5288_v50, %v5008_v20  ;;  %v3795_v56 = vpop.f32.mrb[9].mxu0 }
 0x1f4   : > { %v4019_v58 = vmax.f32 %v3983_v48, 0.0  ;;  %v5339_v60 = vadd.f32 %v3795_v56, %v1645_v21 }
 0x1f5   : > { %4056 = vst [vmem:[%s6619_s16 + $0x38] sm:$0xff] %v4020_v52  ;;  %v3986_v62 = vadd.f32 %v5338_v54, %v6613_v30 }
 0x1f6   : > { %4055 = vst [vmem:[%s6619_s16 + $0x30] sm:$0xff] %v4019_v58  ;;  %v3985_v0 = vadd.f32 %v5339_v60, %v6613_v30  ;;  %v5291_v3 = vpop.f32.mrb[10].mxu0 }
 0x1f7   : > { %v4022_v5 = vmax.f32 %v3986_v62, 0.0  ;;  %v5340_v1 = vadd.f32 %v5291_v3, %v5011_v22  ;;  %v3805_v7 = vpop.f32.mrb[11].mxu0 }
 0x1f8   : > { %v4021_v8 = vmax.f32 %v3985_v0, 0.0  ;;  %v5341_v9 = vadd.f32 %v3805_v7, %v1655_v23 }
 0x1f9   : > { %4058 = vst [vmem:[%s6619_s16 + $0x48] sm:$0xff] %v4022_v5  ;;  %v3988_v10 = vadd.f32 %v5340_v1, %v6613_v30 }
 0x1fa   : > { %4057 = vst [vmem:[%s6619_s16 + $0x40] sm:$0xff] %v4021_v8  ;;  %v3987_v12 = vadd.f32 %v5341_v9, %v6613_v30  ;;  %v5294_v13 = vpop.f32.mrb[12].mxu0 }
 0x1fb   : > { %v4024_v14 = vmax.f32 %v3988_v10, 0.0  ;;  %v5342_v15 = vadd.f32 %v5294_v13, %v6597_v24  ;;  %v3815_v16 = vpop.f32.mrb[13].mxu0 }
 0x1fc   : > { %v4023_v17 = vmax.f32 %v3987_v12, 0.0  ;;  %v5343_v18 = vadd.f32 %v3815_v16, %v6599_v25 }
 0x1fd   : > { %4060 = vst [vmem:[%s6619_s16 + $0x58] sm:$0xff] %v4024_v14  ;;  %v3990_v19 = vadd.f32 %v5342_v15, %v6613_v30 }
 0x1fe   : > { %4059 = vst [vmem:[%s6619_s16 + $0x50] sm:$0xff] %v4023_v17  ;;  %v3989_v20 = vadd.f32 %v5343_v18, %v6613_v30  ;;  %v5297_v21 = vpop.f32.mrb[14].mxu0 }
 0x1ff   : > { %v4026_v22 = vmax.f32 %v3990_v19, 0.0  ;;  %v5344_v23 = vadd.f32 %v5297_v21, %v6601_v26  ;;  %v3825_v29 = vpop.f32.mrb[15].mxu0 }
 0x200   : > { %v4025_v31 = vmax.f32 %v3989_v20, 0.0  ;;  %v5345_v24 = vadd.f32 %v3825_v29, %v6603_v27 }
 0x201   : > { %4062 = vst [vmem:[%s6619_s16 + $0x68] sm:$0xff] %v4026_v22  ;;  %v3992_v32 = vadd.f32 %v5344_v23, %v6613_v30 }
 0x202   : > { %4061 = vst [vmem:[%s6619_s16 + $0x60] sm:$0xff] %v4025_v31  ;;  %v3991_v25 = vadd.f32 %v5345_v24, %v6613_v30  ;;  %v5300_v33 = vpop.f32.mrb[16].mxu0 }
 0x203   : > { %v4028_v34 = vmax.f32 %v3992_v32, 0.0  ;;  %v5346_v35 = vadd.f32 %v5300_v33, %v6605_v11  ;;  %v3835_v36 = vpop.f32.mrb[17].mxu0 }
 0x204   : > { %v4027_v37 = vmax.f32 %v3991_v25, 0.0  ;;  %v5347_v26 = vadd.f32 %v3835_v36, %v6607_v28 }
 0x205   : > { %4064 = vst [vmem:[%s6619_s16 + $0x78] sm:$0xff] %v4028_v34  ;;  %v3994_v38 = vadd.f32 %v5346_v35, %v6613_v30 }
 0x206   : > { %4063 = vst [vmem:[%s6619_s16 + $0x70] sm:$0xff] %v4027_v37  ;;  %v3993_v27 = vadd.f32 %v5347_v26, %v6613_v30  ;;  %v5079_v39 = vpop.f32.mrb[18].mxu1  ;;  %v5303_v40 = vpop.f32.mrb[18].mxu0 }
 0x207   : > { %v4030_v41 = vmax.f32 %v3994_v38, 0.0  ;;  %v5348_v42 = vadd.f32 %v5303_v40, %v5079_v39  ;;  %v2125_v43 = vpop.f32.mrb[19].mxu1  ;;  %v3845_v44 = vpop.f32.mrb[19].mxu0 }
 0x208   : > { %v4029_v11 = vmax.f32 %v3993_v27, 0.0  ;;  %v5349_v45 = vadd.f32 %v3845_v44, %v2125_v43 }
 0x209   : > { %4066 = vst [vmem:[%s6619_s16 + $0x88] sm:$0xff] %v4030_v41  ;;  %v3996_v46 = vadd.f32 %v5348_v42, %v6613_v30 }
 0x20a   : > { %4065 = vst [vmem:[%s6619_s16 + $0x80] sm:$0xff] %v4029_v11  ;;  %v3995_v28 = vadd.f32 %v5349_v45, %v6613_v30  ;;  %v5082_v49 = vpop.f32.mrb[20].mxu1  ;;  %v5306_v51 = vpop.f32.mrb[20].mxu0 }
 0x20b   : > { %v4032_v53 = vmax.f32 %v3996_v46, 0.0  ;;  %v5350_v55 = vadd.f32 %v5306_v51, %v5082_v49  ;;  %v2135_v57 = vpop.f32.mrb[21].mxu1  ;;  %v3855_v59 = vpop.f32.mrb[21].mxu0 }
 0x20c   : > { %v4031_v61 = vmax.f32 %v3995_v28, 0.0  ;;  %v5351_v63 = vadd.f32 %v3855_v59, %v2135_v57 }
 0x20d   : > { %4068 = vst [vmem:[%s6619_s16 + $0x98] sm:$0xff] %v4032_v53  ;;  %v3998_v2 = vadd.f32 %v5350_v55, %v6613_v30 }
 0x20e   : > { %4067 = vst [vmem:[%s6619_s16 + $0x90] sm:$0xff] %v4031_v61  ;;  %v3997_v4 = vadd.f32 %v5351_v63, %v6613_v30  ;;  %v5085_v47 = vpop.f32.mrb[22].mxu1  ;;  %v5309_v6 = vpop.f32.mrb[22].mxu0 }
 0x20f   : > { %v4034_v48 = vmax.f32 %v3998_v2, 0.0  ;;  %v5352_v50 = vadd.f32 %v5309_v6, %v5085_v47  ;;  %v2145_v52 = vpop.f32.mrb[23].mxu1  ;;  %v3865_v54 = vpop.f32.mrb[23].mxu0 }
 0x210   : > { %v4033_v56 = vmax.f32 %v3997_v4, 0.0  ;;  %v5353_v58 = vadd.f32 %v3865_v54, %v2145_v52 }
 0x211   : > { %4070 = vst [vmem:[%s6619_s16 + $0xa8] sm:$0xff] %v4034_v48  ;;  %v4000_v60 = vadd.f32 %v5352_v50, %v6613_v30 }
 0x212   : > { %4069 = vst [vmem:[%s6619_s16 + $0xa0] sm:$0xff] %v4033_v56  ;;  %v3999_v62 = vadd.f32 %v5353_v58, %v6613_v30  ;;  %v5088_v0 = vpop.f32.mrb[24].mxu1  ;;  %v5312_v3 = vpop.f32.mrb[24].mxu0 }
 0x213   : > { %v4036_v5 = vmax.f32 %v4000_v60, 0.0  ;;  %v5354_v1 = vadd.f32 %v5312_v3, %v5088_v0  ;;  %v2155_v7 = vpop.f32.mrb[25].mxu1  ;;  %v3875_v8 = vpop.f32.mrb[25].mxu0 }
 0x214   : > { %v4035_v9 = vmax.f32 %v3999_v62, 0.0  ;;  %v5355_v10 = vadd.f32 %v3875_v8, %v2155_v7 }
 0x215   : > { %4072 = vst [vmem:[%s6619_s16 + $0xb8] sm:$0xff] %v4036_v5  ;;  %v4002_v12 = vadd.f32 %v5354_v1, %v6613_v30 }
 0x216   : > { %4071 = vst [vmem:[%s6619_s16 + $0xb0] sm:$0xff] %v4035_v9  ;;  %v4001_v13 = vadd.f32 %v5355_v10, %v6613_v30  ;;  %v5091_v14 = vpop.f32.mrb[26].mxu1  ;;  %v5315_v15 = vpop.f32.mrb[26].mxu0 }
 0x217   : > { %v4038_v16 = vmax.f32 %v4002_v12, 0.0  ;;  %v5356_v17 = vadd.f32 %v5315_v15, %v5091_v14  ;;  %v2165_v18 = vpop.f32.mrb[27].mxu1  ;;  %v3885_v19 = vpop.f32.mrb[27].mxu0 }
 0x218   : > { %v4037_v20 = vmax.f32 %v4001_v13, 0.0  ;;  %v5357_v21 = vadd.f32 %v3885_v19, %v2165_v18 }
 0x219   : > { %4074 = vst [vmem:[%s6619_s16 + $0xc8] sm:$0xff] %v4038_v16  ;;  %v4004_v22 = vadd.f32 %v5356_v17, %v6613_v30 }
 0x21a   : > { %4073 = vst [vmem:[%s6619_s16 + $0xc0] sm:$0xff] %v4037_v20  ;;  %v4003_v23 = vadd.f32 %v5357_v21, %v6613_v30  ;;  %v5094_v29 = vpop.f32.mrb[28].mxu1  ;;  %v5318_v31 = vpop.f32.mrb[28].mxu0 }
 0x21b   : > { %v4040_v24 = vmax.f32 %v4004_v22, 0.0  ;;  %v5358_v32 = vadd.f32 %v5318_v31, %v5094_v29  ;;  %v2175_v25 = vpop.f32.mrb[29].mxu1  ;;  %v3895_v33 = vpop.f32.mrb[29].mxu0 }
 0x21c   : > { %v4039_v34 = vmax.f32 %v4003_v23, 0.0  ;;  %v5359_v35 = vadd.f32 %v3895_v33, %v2175_v25 }
 0x21d   : > { %4076 = vst [vmem:[%s6619_s16 + $0xd8] sm:$0xff] %v4040_v24  ;;  %v4006_v36 = vadd.f32 %v5358_v32, %v6613_v30 }
 0x21e   : > { %4075 = vst [vmem:[%s6619_s16 + $0xd0] sm:$0xff] %v4039_v34  ;;  %v4005_v37 = vadd.f32 %v5359_v35, %v6613_v30  ;;  %v5097_v26 = vpop.f32.mrb[30].mxu1  ;;  %v5321_v38 = vpop.f32.mrb[30].mxu0 }
 0x21f   : > { %v4042_v27 = vmax.f32 %v4006_v36, 0.0  ;;  %v5360_v39 = vadd.f32 %v5321_v38, %v5097_v26  ;;  %v2185_v40 = vpop.f32.mrb[31].mxu1  ;;  %v3905_v41 = vpop.f32.mrb[31].mxu0 }
 0x220   : > { %v4041_v42 = vmax.f32 %v4005_v37, 0.0  ;;  %v5361_v43 = vadd.f32 %v3905_v41, %v2185_v40 }
 0x221   : > { %4078 = vst [vmem:[%s6619_s16 + $0xe8] sm:$0xff] %v4042_v27  ;;  %v4008_v44 = vadd.f32 %v5360_v39, %v6613_v30 }
 0x222   : > { %4077 = vst [vmem:[%s6619_s16 + $0xe0] sm:$0xff] %v4041_v42  ;;  %v4007_v11 = vadd.f32 %v5361_v43, %v6613_v30  ;;  %v5100_v45 = vpop.f32.mrb[32].mxu1  ;;  %v5324_v46 = vpop.f32.mrb[32].mxu0 }
 0x223   : > { %v4044_v28 = vmax.f32 %v4008_v44, 0.0  ;;  %v5362_v49 = vadd.f32 %v5324_v46, %v5100_v45  ;;  %v2195_v51 = vpop.f32.mrb[33].mxu1  ;;  %v3915_v53 = vpop.f32.mrb[33].mxu0 }
 0x224   : > { %v4043_v55 = vmax.f32 %v4007_v11, 0.0  ;;  %v5363_v57 = vadd.f32 %v3915_v53, %v2195_v51 }
 0x225   : > { %4080 = vst [vmem:[%s6619_s16 + $0xf8] sm:$0xff] %v4044_v28  ;;  %v4010_v59 = vadd.f32 %v5362_v49, %v6613_v30 }
 0x226   : > { %4079 = vst [vmem:[%s6619_s16 + $0xf0] sm:$0xff] %v4043_v55  ;;  %v4009_v61 = vadd.f32 %v5363_v57, %v6613_v30  ;;  %v5103_v63 = vpop.f32.mrb[34].mxu1  ;;  %v5327_v2 = vpop.f32.mrb[34].mxu0 }
 0x227   : > { %v4046_v4 = vmax.f32 %v4010_v59, 0.0  ;;  %v5364_v47 = vadd.f32 %v5327_v2, %v5103_v63  ;;  %v2205_v6 = vpop.f32.mrb[35].mxu1  ;;  %v3925_v48 = vpop.f32.mrb[35].mxu0 }
 0x228   : > { %v4045_v50 = vmax.f32 %v4009_v61, 0.0  ;;  %v5365_v52 = vadd.f32 %v3925_v48, %v2205_v6 }
 0x229   : > { %4082 = vst [vmem:[%s6619_s16 + $0x108] sm:$0xff] %v4046_v4  ;;  %v4012_v54 = vadd.f32 %v5364_v47, %v6613_v30 }
 0x22a   : > { %4081 = vst [vmem:[%s6619_s16 + $0x100] sm:$0xff] %v4045_v50  ;;  %v4011_v56 = vadd.f32 %v5365_v52, %v6613_v30 }
 0x22b   : > { %v4048_v58 = vmax.f32 %v4012_v54, 0.0 }
 0x22c   : > { %v4047_v60 = vmax.f32 %v4011_v56, 0.0 }
 0x22d   : > { %4084 = vst [vmem:[%s6619_s16 + $0x118] sm:$0xff] %v4048_v58 }
 0x22e   : > { %4083 = vst [vmem:[%s6619_s16 + $0x110] sm:$0xff] %v4047_v60 }
 0x22f PF: > { %s13_s12 = sadd.s32 1, %s5634_s12  }
 0x230   : > { %p10_p4 = scmp.ge.s32.totalorder %s13_s12, 4  }
 0x232   :  { %12 = sbr.rel (!%p10_p4) target bundleno = 1 (0x1), region = 70 }

</bundles_post_ra>
